<compile_context>
chip_gen: v7x
topology: tpu7x:2x2x1
jax: 0.10.0
libtpu: 0.0.40
codegen_flags: <defaults>
</compile_context>

<pallas_src>
import functools
import math

import jax
import jax.numpy as jnp
from jax.experimental import pallas as pl
from jax.experimental.pallas import tpu as pltpu

EPS = 1e-6


# ------------------------------ kernel helpers --------------------------------

def _layer_norm(x, g, b, d):
    # a2 * (x - mean) / (std_unbiased + eps) + b2   (torch.std is unbiased: / (D-1))
    mean = jnp.mean(x, axis=-1, keepdims=True)
    c = x - mean
    var = jnp.sum(c * c, axis=-1, keepdims=True) / (d - 1)
    std = jnp.sqrt(var)
    return g * c / (std + EPS) + b


# ------------------------------ fused kernel ----------------------------------

def _encoder_kernel(
    x_ref, bias_ref,
    ln0g_ref, ln0b_ref, ln1g_ref, ln1b_ref,
    wq_ref, wk_ref, wv_ref, bq_ref, bk_ref, bv_ref,
    wo_ref, bo_ref, w1_ref, b1_ref, w2_ref, b2_ref,
    fng_ref, fnb_ref,
    o_ref,
    *, n_layers,
):
    S, D = x_ref.shape
    H = wq_ref.shape[0]

    x = x_ref[...]                      # (S, D) residual stream, f32, VMEM-resident
    bias = bias_ref[...]                # (1, S) additive mask bias: 0 keep / -1e9 masked

    # One shared layer-parameter set (clones() deep-copies -> all layers identical).
    ln0g, ln0b = ln0g_ref[...], ln0b_ref[...]
    ln1g, ln1b = ln1g_ref[...], ln1b_ref[...]
    wq, wk, wv = wq_ref[...], wk_ref[...], wv_ref[...]   # (H, D, dk); 1/sqrt(dk) folded into wq
    bq, bk, bv = bq_ref[...], bk_ref[...], bv_ref[...]   # (H, 1, dk)
    wo, bo = wo_ref[...], bo_ref[...]                    # (H, dk, D), (1, D)
    w1, b1 = w1_ref[...], b1_ref[...]                    # (D, DFF), (1, DFF)
    w2, b2 = w2_ref[...], b2_ref[...]                    # (DFF, D), (1, D)

    for _ in range(n_layers):           # static unroll; identical weights every layer
        # ---------------- self-attention sublayer (pre-LN + residual) ----------
        y = _layer_norm(x, ln0g, ln0b, D)
        y_h = jnp.broadcast_to(y, (H, S, D))             # head-batched view, no relayout loops
        q = jnp.einsum('hsd,hdf->hsf', y_h, wq, preferred_element_type=jnp.float32) + bq
        k = jnp.einsum('hsd,hdf->hsf', y_h, wk, preferred_element_type=jnp.float32) + bk
        v = jnp.einsum('hsd,hdf->hsf', y_h, wv, preferred_element_type=jnp.float32) + bv

        # scores already scaled (scale folded into wq/bq); additive mask bias broadcasts
        # over heads and query rows.
        s = jnp.einsum('hqd,hkd->hqk', q, k, preferred_element_type=jnp.float32) + bias
        mx = jnp.max(s, axis=-1, keepdims=True)
        e = jnp.exp(s - mx)
        p = e * pl.reciprocal(jnp.sum(e, axis=-1, keepdims=True), approx=True)
        ctx = jnp.einsum('hqk,hkd->hqd', p, v, preferred_element_type=jnp.float32)  # (H,S,dk)

        # Output projection: sum_h ctx_h @ Wo_h  ==  concat_h(ctx_h) @ Wo  (no head-merge
        # concat/transpose needed).
        attn = jnp.sum(
            jnp.einsum('hsd,hde->hse', ctx, wo, preferred_element_type=jnp.float32),
            axis=0) + bo
        x = x + attn                    # dropout = identity (eval mode)

        # ---------------- feed-forward sublayer (pre-LN + residual) ------------
        y = _layer_norm(x, ln1g, ln1b, D)
        h1 = jnp.maximum(jnp.dot(y, w1, preferred_element_type=jnp.float32) + b1, 0.0)
        x = x + jnp.dot(h1, w2, preferred_element_type=jnp.float32) + b2

    # final Encoder LayerNorm (output is (S, D); D=32 < 128 lanes is inherent here)
    o_ref[...] = _layer_norm(x, fng_ref[...], fnb_ref[...], D).astype(o_ref.dtype)


# --------------------------------- wrapper -------------------------------------

def encoder_forward(x, mask, params):
    """x: [B, S, D] float32; mask: [B, 1, S] (1 = keep, 0 = masked)."""
    B, S, D = x.shape

    # masked_fill(mask==0, -1e9)  ->  precomputed additive bias (host-side, one-time).
    bias = (mask.astype(jnp.float32) - 1.0) * 1e9            # (B, 1, S): 0 keep / -1e9 masked

    weights = (
        params["ln0_g"], params["ln0_b"], params["ln1_g"], params["ln1_b"],
        params["wq"], params["wk"], params["wv"],
        params["bq"], params["bk"], params["bv"],
        params["wo"], params["bo"],
        params["w1"], params["b1"], params["w2"], params["b2"],
        params["norm_g"], params["norm_b"],
    )

    def _full_spec(arr):
        zeros = (0,) * arr.ndim
        # Same block index every grid step -> loaded once, stays VMEM-resident.
        return pl.BlockSpec(arr.shape, lambda b: zeros)

    in_specs = [
        pl.BlockSpec((None, S, D), lambda b: (b, 0, 0)),     # one batch row per grid step
        pl.BlockSpec((None, 1, S), lambda b: (b, 0, 0)),     # its additive mask bias
    ] + [_full_spec(w) for w in weights]

    kernel = functools.partial(_encoder_kernel, n_layers=params["n_layers"])

    return pl.pallas_call(
        kernel,
        grid=(B,),
        in_specs=in_specs,
        out_specs=pl.BlockSpec((None, S, D), lambda b: (b, 0, 0)),
        out_shape=jax.ShapeDtypeStruct((B, S, D), x.dtype),
        compiler_params=pltpu.CompilerParams(
            dimension_semantics=("parallel",),               # shard batch over v7x's 2 TCs
            vmem_limit_bytes=32 * 1024 * 1024,
        ),
    )(x, bias, *weights)


# --------------------------- parameter construction ----------------------------

def init_params(key, d_model, d_ff, n_heads, n_layers):
    ks = jax.random.split(key, 12)
    scale = 0.05
    dk = d_model // n_heads

    def w(k, shape):
        return (scale * jax.random.normal(k, shape)).astype(jnp.float32)

    wq, bq = w(ks[0], (d_model, d_model)), w(ks[1], (d_model,))
    wk, bk = w(ks[2], (d_model, d_model)), w(ks[3], (d_model,))
    wv, bv = w(ks[4], (d_model, d_model)), w(ks[5], (d_model,))
    wo, bo = w(ks[6], (d_model, d_model)), w(ks[7], (d_model,))
    w1, b1 = w(ks[8], (d_model, d_ff)), w(ks[9], (d_ff,))
    w2, b2 = w(ks[10], (d_ff, d_model)), w(ks[11], (d_model,))

    q_scale = 1.0 / math.sqrt(dk)       # fold 1/sqrt(dk) into the Q projection

    def head_major(wmat):               # (D, H*dk) columns -> (H, D, dk)
        return jnp.transpose(wmat.reshape(d_model, n_heads, dk), (1, 0, 2))

    def head_bias(bvec):                # (H*dk,) -> (H, 1, dk)
        return bvec.reshape(n_heads, 1, dk)

    # clones() deep-copies the layer N times -> identical params; keep ONE set.
    return {
        "n_layers": n_layers,
        "wq": head_major(wq) * q_scale, "bq": head_bias(bq) * q_scale,
        "wk": head_major(wk),           "bk": head_bias(bk),
        "wv": head_major(wv),           "bv": head_bias(bv),
        "wo": wo.reshape(n_heads, dk, d_model),              # (H, dk, D)
        "bo": bo.reshape(1, d_model),
        "w1": w1, "b1": b1.reshape(1, d_ff),
        "w2": w2, "b2": b2.reshape(1, d_model),
        "ln0_g": jnp.ones((1, d_model), jnp.float32),
        "ln0_b": jnp.zeros((1, d_model), jnp.float32),
        "ln1_g": jnp.ones((1, d_model), jnp.float32),
        "ln1_b": jnp.zeros((1, d_model), jnp.float32),
        "norm_g": jnp.ones((1, d_model), jnp.float32),
        "norm_b": jnp.zeros((1, d_model), jnp.float32),
    }


# ------------------------------------ main --------------------------------------

if __name__ == "__main__":
    B, S, D = 2, 8, 32
    H, DFF, NLAYERS = 4, 64, 2

    key = jax.random.PRNGKey(0)
    kx, kp = jax.random.split(key)

    x = jax.random.normal(kx, (B, S, D), dtype=jnp.float32)
    # mask: [B, 1, S]; second sequence has its last 2 positions padded out.
    mask = jnp.ones((B, 1, S), dtype=jnp.int32)
    mask = mask.at[1, 0, -2:].set(0)

    params = init_params(kp, D, DFF, H, NLAYERS)

    fwd = jax.jit(functools.partial(encoder_forward, params=params))
    out = fwd(x, mask)
    jax.block_until_ready(out)

    assert out.shape == (B, S, D) and out.dtype == jnp.float32
    assert bool(jnp.all(jnp.isfinite(out)))
    print("KERNEL_OK")
</pallas_src>

<mosaic_0001>
module attributes {stable_mosaic.version = 11 : i64} {
  func.func @_encoder_kernel(%arg0: i32, %arg1: memref<1x8x32xf32, #tpu.memory_space<vmem>>, %arg2: memref<1x1x8xf32, #tpu.memory_space<vmem>>, %arg3: memref<1x32xf32, #tpu.memory_space<vmem>>, %arg4: memref<1x32xf32, #tpu.memory_space<vmem>>, %arg5: memref<1x32xf32, #tpu.memory_space<vmem>>, %arg6: memref<1x32xf32, #tpu.memory_space<vmem>>, %arg7: memref<4x32x8xf32, #tpu.memory_space<vmem>>, %arg8: memref<4x32x8xf32, #tpu.memory_space<vmem>>, %arg9: memref<4x32x8xf32, #tpu.memory_space<vmem>>, %arg10: memref<4x1x8xf32, #tpu.memory_space<vmem>>, %arg11: memref<4x1x8xf32, #tpu.memory_space<vmem>>, %arg12: memref<4x1x8xf32, #tpu.memory_space<vmem>>, %arg13: memref<4x8x32xf32, #tpu.memory_space<vmem>>, %arg14: memref<1x32xf32, #tpu.memory_space<vmem>>, %arg15: memref<32x64xf32, #tpu.memory_space<vmem>>, %arg16: memref<1x64xf32, #tpu.memory_space<vmem>>, %arg17: memref<64x32xf32, #tpu.memory_space<vmem>>, %arg18: memref<1x32xf32, #tpu.memory_space<vmem>>, %arg19: memref<1x32xf32, #tpu.memory_space<vmem>>, %arg20: memref<1x32xf32, #tpu.memory_space<vmem>>, %arg21: memref<1x8x32xf32, #tpu.memory_space<vmem>>) attributes {dimension_semantics = [#tpu.dimension_semantics<parallel>], iteration_bounds = array<i64: 2>, scalar_prefetch = 0 : i64, scratch_operands = 0 : i64, tpu.core_type = #tpu.core_type<tc>, window_params = [{transform_indices = @transform_0, window_bounds = array<i64: 1, 8, 32>}, {transform_indices = @transform_1, window_bounds = array<i64: 1, 1, 8>}, {pipeline_mode = #tpu.pipeline_mode<synchronous>, transform_indices = @transform_2, window_bounds = array<i64: 1, 32>}, {pipeline_mode = #tpu.pipeline_mode<synchronous>, transform_indices = @transform_3, window_bounds = array<i64: 1, 32>}, {pipeline_mode = #tpu.pipeline_mode<synchronous>, transform_indices = @transform_4, window_bounds = array<i64: 1, 32>}, {pipeline_mode = #tpu.pipeline_mode<synchronous>, transform_indices = @transform_5, window_bounds = array<i64: 1, 32>}, {pipeline_mode = #tpu.pipeline_mode<synchronous>, transform_indices = @transform_6, window_bounds = array<i64: 4, 32, 8>}, {pipeline_mode = #tpu.pipeline_mode<synchronous>, transform_indices = @transform_7, window_bounds = array<i64: 4, 32, 8>}, {pipeline_mode = #tpu.pipeline_mode<synchronous>, transform_indices = @transform_8, window_bounds = array<i64: 4, 32, 8>}, {pipeline_mode = #tpu.pipeline_mode<synchronous>, transform_indices = @transform_9, window_bounds = array<i64: 4, 1, 8>}, {pipeline_mode = #tpu.pipeline_mode<synchronous>, transform_indices = @transform_10, window_bounds = array<i64: 4, 1, 8>}, {pipeline_mode = #tpu.pipeline_mode<synchronous>, transform_indices = @transform_11, window_bounds = array<i64: 4, 1, 8>}, {pipeline_mode = #tpu.pipeline_mode<synchronous>, transform_indices = @transform_12, window_bounds = array<i64: 4, 8, 32>}, {pipeline_mode = #tpu.pipeline_mode<synchronous>, transform_indices = @transform_13, window_bounds = array<i64: 1, 32>}, {pipeline_mode = #tpu.pipeline_mode<synchronous>, transform_indices = @transform_14, window_bounds = array<i64: 32, 64>}, {pipeline_mode = #tpu.pipeline_mode<synchronous>, transform_indices = @transform_15, window_bounds = array<i64: 1, 64>}, {pipeline_mode = #tpu.pipeline_mode<synchronous>, transform_indices = @transform_16, window_bounds = array<i64: 64, 32>}, {pipeline_mode = #tpu.pipeline_mode<synchronous>, transform_indices = @transform_17, window_bounds = array<i64: 1, 32>}, {pipeline_mode = #tpu.pipeline_mode<synchronous>, transform_indices = @transform_18, window_bounds = array<i64: 1, 32>}, {pipeline_mode = #tpu.pipeline_mode<synchronous>, transform_indices = @transform_19, window_bounds = array<i64: 1, 32>}, {transform_indices = @transform_20, window_bounds = array<i64: 1, 8, 32>}]} {
    %c0 = arith.constant 0 : index
    %c0_0 = arith.constant 0 : index
    %c0_1 = arith.constant 0 : index
    %0 = vector.load %arg1[%c0, %c0_0, %c0_1] : memref<1x8x32xf32, #tpu.memory_space<vmem>>, vector<1x8x32xf32>
    %1 = vector.shape_cast %0 : vector<1x8x32xf32> to vector<8x32xf32>
    %c0_2 = arith.constant 0 : index
    %c0_3 = arith.constant 0 : index
    %c0_4 = arith.constant 0 : index
    %2 = vector.load %arg2[%c0_2, %c0_3, %c0_4] : memref<1x1x8xf32, #tpu.memory_space<vmem>>, vector<1x1x8xf32>
    %3 = vector.shape_cast %2 : vector<1x1x8xf32> to vector<1x8xf32>
    %c0_5 = arith.constant 0 : index
    %c0_6 = arith.constant 0 : index
    %4 = vector.load %arg3[%c0_5, %c0_6] : memref<1x32xf32, #tpu.memory_space<vmem>>, vector<1x32xf32>
    %c0_7 = arith.constant 0 : index
    %c0_8 = arith.constant 0 : index
    %5 = vector.load %arg4[%c0_7, %c0_8] : memref<1x32xf32, #tpu.memory_space<vmem>>, vector<1x32xf32>
    %c0_9 = arith.constant 0 : index
    %c0_10 = arith.constant 0 : index
    %6 = vector.load %arg5[%c0_9, %c0_10] : memref<1x32xf32, #tpu.memory_space<vmem>>, vector<1x32xf32>
    %c0_11 = arith.constant 0 : index
    %c0_12 = arith.constant 0 : index
    %7 = vector.load %arg6[%c0_11, %c0_12] : memref<1x32xf32, #tpu.memory_space<vmem>>, vector<1x32xf32>
    %c0_13 = arith.constant 0 : index
    %c0_14 = arith.constant 0 : index
    %c0_15 = arith.constant 0 : index
    %8 = vector.load %arg7[%c0_13, %c0_14, %c0_15] : memref<4x32x8xf32, #tpu.memory_space<vmem>>, vector<4x32x8xf32>
    %c0_16 = arith.constant 0 : index
    %c0_17 = arith.constant 0 : index
    %c0_18 = arith.constant 0 : index
    %9 = vector.load %arg8[%c0_16, %c0_17, %c0_18] : memref<4x32x8xf32, #tpu.memory_space<vmem>>, vector<4x32x8xf32>
    %c0_19 = arith.constant 0 : index
    %c0_20 = arith.constant 0 : index
    %c0_21 = arith.constant 0 : index
    %10 = vector.load %arg9[%c0_19, %c0_20, %c0_21] : memref<4x32x8xf32, #tpu.memory_space<vmem>>, vector<4x32x8xf32>
    %c0_22 = arith.constant 0 : index
    %c0_23 = arith.constant 0 : index
    %c0_24 = arith.constant 0 : index
    %11 = vector.load %arg10[%c0_22, %c0_23, %c0_24] : memref<4x1x8xf32, #tpu.memory_space<vmem>>, vector<4x1x8xf32>
    %c0_25 = arith.constant 0 : index
    %c0_26 = arith.constant 0 : index
    %c0_27 = arith.constant 0 : index
    %12 = vector.load %arg11[%c0_25, %c0_26, %c0_27] : memref<4x1x8xf32, #tpu.memory_space<vmem>>, vector<4x1x8xf32>
    %c0_28 = arith.constant 0 : index
    %c0_29 = arith.constant 0 : index
    %c0_30 = arith.constant 0 : index
    %13 = vector.load %arg12[%c0_28, %c0_29, %c0_30] : memref<4x1x8xf32, #tpu.memory_space<vmem>>, vector<4x1x8xf32>
    %c0_31 = arith.constant 0 : index
    %c0_32 = arith.constant 0 : index
    %c0_33 = arith.constant 0 : index
    %14 = vector.load %arg13[%c0_31, %c0_32, %c0_33] : memref<4x8x32xf32, #tpu.memory_space<vmem>>, vector<4x8x32xf32>
    %c0_34 = arith.constant 0 : index
    %c0_35 = arith.constant 0 : index
    %15 = vector.load %arg14[%c0_34, %c0_35] : memref<1x32xf32, #tpu.memory_space<vmem>>, vector<1x32xf32>
    %c0_36 = arith.constant 0 : index
    %c0_37 = arith.constant 0 : index
    %16 = vector.load %arg15[%c0_36, %c0_37] : memref<32x64xf32, #tpu.memory_space<vmem>>, vector<32x64xf32>
    %c0_38 = arith.constant 0 : index
    %c0_39 = arith.constant 0 : index
    %17 = vector.load %arg16[%c0_38, %c0_39] : memref<1x64xf32, #tpu.memory_space<vmem>>, vector<1x64xf32>
    %c0_40 = arith.constant 0 : index
    %c0_41 = arith.constant 0 : index
    %18 = vector.load %arg17[%c0_40, %c0_41] : memref<64x32xf32, #tpu.memory_space<vmem>>, vector<64x32xf32>
    %c0_42 = arith.constant 0 : index
    %c0_43 = arith.constant 0 : index
    %19 = vector.load %arg18[%c0_42, %c0_43] : memref<1x32xf32, #tpu.memory_space<vmem>>, vector<1x32xf32>
    %cst = arith.constant dense<0.000000e+00> : vector<8xf32>
    %20 = vector.multi_reduction <add>, %1, %cst [1] : vector<8x32xf32> to vector<8xf32>
    %21 = vector.shape_cast %20 : vector<8xf32> to vector<8x1xf32>
    %cst_44 = arith.constant 3.200000e+01 : f32
    %22 = vector.broadcast %cst_44 : f32 to vector<8x1xf32>
    %23 = arith.divf %21, %22 : vector<8x1xf32>
    %24 = vector.broadcast %23 : vector<8x1xf32> to vector<8x32xf32>
    %25 = arith.subf %1, %24 : vector<8x32xf32>
    %26 = arith.mulf %25, %25 : vector<8x32xf32>
    %cst_45 = arith.constant dense<0.000000e+00> : vector<8xf32>
    %27 = vector.multi_reduction <add>, %26, %cst_45 [1] : vector<8x32xf32> to vector<8xf32>
    %28 = vector.shape_cast %27 : vector<8xf32> to vector<8x1xf32>
    %cst_46 = arith.constant 3.100000e+01 : f32
    %29 = vector.broadcast %cst_46 : f32 to vector<8x1xf32>
    %30 = arith.divf %28, %29 : vector<8x1xf32>
    %31 = math.sqrt %30 : vector<8x1xf32>
    %32 = vector.broadcast %4 : vector<1x32xf32> to vector<8x32xf32>
    %33 = arith.mulf %32, %25 : vector<8x32xf32>
    %cst_47 = arith.constant 9.99999997E-7 : f32
    %34 = vector.broadcast %cst_47 : f32 to vector<8x1xf32>
    %35 = arith.addf %31, %34 : vector<8x1xf32>
    %36 = vector.broadcast %35 : vector<8x1xf32> to vector<8x32xf32>
    %37 = arith.divf %33, %36 : vector<8x32xf32>
    %38 = vector.broadcast %5 : vector<1x32xf32> to vector<8x32xf32>
    %39 = arith.addf %37, %38 : vector<8x32xf32>
    %40 = vector.shape_cast %39 : vector<8x32xf32> to vector<1x8x32xf32>
    %41 = vector.broadcast %40 : vector<1x8x32xf32> to vector<4x8x32xf32>
    "tpu.trace_start"() <{level = 10 : i32, message = "hsd,hdf->hsf"}> : () -> ()
    %cst_48 = arith.constant dense<0.000000e+00> : vector<4x8x8xf32>
    %42 = tpu.matmul %41, %8, %cst_48 {dimension_numbers = #tpu.dot_dimension_numbers<[2], [1], [1], [2], [0, 0, 0, 1, 1, 2], [0], [0]>} : vector<4x8x32xf32>, vector<4x32x8xf32>, vector<4x8x8xf32> -> vector<4x8x8xf32>
    "tpu.trace_stop"() : () -> ()
    %43 = vector.broadcast %11 : vector<4x1x8xf32> to vector<4x8x8xf32>
    %44 = arith.addf %42, %43 : vector<4x8x8xf32>
    "tpu.trace_start"() <{level = 10 : i32, message = "hsd,hdf->hsf"}> : () -> ()
    %cst_49 = arith.constant dense<0.000000e+00> : vector<4x8x8xf32>
    %45 = tpu.matmul %41, %9, %cst_49 {dimension_numbers = #tpu.dot_dimension_numbers<[2], [1], [1], [2], [0, 0, 0, 1, 1, 2], [0], [0]>} : vector<4x8x32xf32>, vector<4x32x8xf32>, vector<4x8x8xf32> -> vector<4x8x8xf32>
    "tpu.trace_stop"() : () -> ()
    %46 = vector.broadcast %12 : vector<4x1x8xf32> to vector<4x8x8xf32>
    %47 = arith.addf %45, %46 : vector<4x8x8xf32>
    "tpu.trace_start"() <{level = 10 : i32, message = "hsd,hdf->hsf"}> : () -> ()
    %cst_50 = arith.constant dense<0.000000e+00> : vector<4x8x8xf32>
    %48 = tpu.matmul %41, %10, %cst_50 {dimension_numbers = #tpu.dot_dimension_numbers<[2], [1], [1], [2], [0, 0, 0, 1, 1, 2], [0], [0]>} : vector<4x8x32xf32>, vector<4x32x8xf32>, vector<4x8x8xf32> -> vector<4x8x8xf32>
    "tpu.trace_stop"() : () -> ()
    %49 = vector.broadcast %13 : vector<4x1x8xf32> to vector<4x8x8xf32>
    %50 = arith.addf %48, %49 : vector<4x8x8xf32>
    "tpu.trace_start"() <{level = 10 : i32, message = "hqd,hkd->hqk"}> : () -> ()
    %cst_51 = arith.constant dense<0.000000e+00> : vector<4x8x8xf32>
    %51 = tpu.matmul %44, %47, %cst_51 {dimension_numbers = #tpu.dot_dimension_numbers<[2], [2], [1], [1], [0, 0, 0, 1, 1, 1], [0], [0]>} : vector<4x8x8xf32>, vector<4x8x8xf32>, vector<4x8x8xf32> -> vector<4x8x8xf32>
    "tpu.trace_stop"() : () -> ()
    %52 = vector.shape_cast %3 : vector<1x8xf32> to vector<1x1x8xf32>
    %53 = vector.broadcast %52 : vector<1x1x8xf32> to vector<4x8x8xf32>
    %54 = arith.addf %51, %53 : vector<4x8x8xf32>
    %cst_52 = arith.constant dense<0xFF800000> : vector<4x8xf32>
    %55 = vector.multi_reduction <maximumf>, %54, %cst_52 [2] : vector<4x8x8xf32> to vector<4x8xf32>
    %56 = vector.shape_cast %55 : vector<4x8xf32> to vector<4x8x1xf32>
    %57 = vector.broadcast %56 : vector<4x8x1xf32> to vector<4x8x8xf32>
    %58 = arith.subf %54, %57 : vector<4x8x8xf32>
    %59 = math.exp %58 : vector<4x8x8xf32>
    %cst_53 = arith.constant dense<0.000000e+00> : vector<4x8xf32>
    %60 = vector.multi_reduction <add>, %59, %cst_53 [2] : vector<4x8x8xf32> to vector<4x8xf32>
    %61 = vector.shape_cast %60 : vector<4x8xf32> to vector<4x8x1xf32>
    %62 = tpu.reciprocal %61 {approx = true} : vector<4x8x1xf32> -> vector<4x8x1xf32>
    %63 = vector.broadcast %62 : vector<4x8x1xf32> to vector<4x8x8xf32>
    %64 = arith.mulf %59, %63 : vector<4x8x8xf32>
    "tpu.trace_start"() <{level = 10 : i32, message = "hqk,hkd->hqd"}> : () -> ()
    %cst_54 = arith.constant dense<0.000000e+00> : vector<4x8x8xf32>
    %65 = tpu.matmul %64, %50, %cst_54 {dimension_numbers = #tpu.dot_dimension_numbers<[2], [1], [1], [2], [0, 0, 0, 1, 1, 2], [0], [0]>} : vector<4x8x8xf32>, vector<4x8x8xf32>, vector<4x8x8xf32> -> vector<4x8x8xf32>
    "tpu.trace_stop"() : () -> ()
    "tpu.trace_start"() <{level = 10 : i32, message = "hsd,hde->hse"}> : () -> ()
    %cst_55 = arith.constant dense<0.000000e+00> : vector<4x8x32xf32>
    %66 = tpu.matmul %65, %14, %cst_55 {dimension_numbers = #tpu.dot_dimension_numbers<[2], [1], [1], [2], [0, 0, 0, 1, 1, 2], [0], [0]>} : vector<4x8x8xf32>, vector<4x8x32xf32>, vector<4x8x32xf32> -> vector<4x8x32xf32>
    "tpu.trace_stop"() : () -> ()
    %cst_56 = arith.constant dense<0.000000e+00> : vector<8x32xf32>
    %67 = vector.multi_reduction <add>, %66, %cst_56 [0] : vector<4x8x32xf32> to vector<8x32xf32>
    %68 = vector.broadcast %15 : vector<1x32xf32> to vector<8x32xf32>
    %69 = arith.addf %67, %68 : vector<8x32xf32>
    %70 = arith.addf %1, %69 : vector<8x32xf32>
    %cst_57 = arith.constant dense<0.000000e+00> : vector<8xf32>
    %71 = vector.multi_reduction <add>, %70, %cst_57 [1] : vector<8x32xf32> to vector<8xf32>
    %72 = vector.shape_cast %71 : vector<8xf32> to vector<8x1xf32>
    %cst_58 = arith.constant 3.200000e+01 : f32
    %73 = vector.broadcast %cst_58 : f32 to vector<8x1xf32>
    %74 = arith.divf %72, %73 : vector<8x1xf32>
    %75 = vector.broadcast %74 : vector<8x1xf32> to vector<8x32xf32>
    %76 = arith.subf %70, %75 : vector<8x32xf32>
    %77 = arith.mulf %76, %76 : vector<8x32xf32>
    %cst_59 = arith.constant dense<0.000000e+00> : vector<8xf32>
    %78 = vector.multi_reduction <add>, %77, %cst_59 [1] : vector<8x32xf32> to vector<8xf32>
    %79 = vector.shape_cast %78 : vector<8xf32> to vector<8x1xf32>
    %cst_60 = arith.constant 3.100000e+01 : f32
    %80 = vector.broadcast %cst_60 : f32 to vector<8x1xf32>
    %81 = arith.divf %79, %80 : vector<8x1xf32>
    %82 = math.sqrt %81 : vector<8x1xf32>
    %83 = vector.broadcast %6 : vector<1x32xf32> to vector<8x32xf32>
    %84 = arith.mulf %83, %76 : vector<8x32xf32>
    %cst_61 = arith.constant 9.99999997E-7 : f32
    %85 = vector.broadcast %cst_61 : f32 to vector<8x1xf32>
    %86 = arith.addf %82, %85 : vector<8x1xf32>
    %87 = vector.broadcast %86 : vector<8x1xf32> to vector<8x32xf32>
    %88 = arith.divf %84, %87 : vector<8x32xf32>
    %89 = vector.broadcast %7 : vector<1x32xf32> to vector<8x32xf32>
    %90 = arith.addf %88, %89 : vector<8x32xf32>
    %cst_62 = arith.constant dense<0.000000e+00> : vector<8x64xf32>
    %91 = tpu.matmul %90, %16, %cst_62 {dimension_numbers = #tpu.dot_dimension_numbers<[1], [0], [0], [1], [0, 0, 1, 1], [], []>} : vector<8x32xf32>, vector<32x64xf32>, vector<8x64xf32> -> vector<8x64xf32>
    %92 = vector.broadcast %17 : vector<1x64xf32> to vector<8x64xf32>
    %93 = arith.addf %91, %92 : vector<8x64xf32>
    %cst_63 = arith.constant 0.000000e+00 : f32
    %94 = vector.broadcast %cst_63 : f32 to vector<8x64xf32>
    %95 = arith.maximumf %93, %94 : vector<8x64xf32>
    %cst_64 = arith.constant dense<0.000000e+00> : vector<8x32xf32>
    %96 = tpu.matmul %95, %18, %cst_64 {dimension_numbers = #tpu.dot_dimension_numbers<[1], [0], [0], [1], [0, 0, 1, 1], [], []>} : vector<8x64xf32>, vector<64x32xf32>, vector<8x32xf32> -> vector<8x32xf32>
    %97 = arith.addf %70, %96 : vector<8x32xf32>
    %98 = vector.broadcast %19 : vector<1x32xf32> to vector<8x32xf32>
    %99 = arith.addf %97, %98 : vector<8x32xf32>
    %cst_65 = arith.constant dense<0.000000e+00> : vector<8xf32>
    %100 = vector.multi_reduction <add>, %99, %cst_65 [1] : vector<8x32xf32> to vector<8xf32>
    %101 = vector.shape_cast %100 : vector<8xf32> to vector<8x1xf32>
    %cst_66 = arith.constant 3.200000e+01 : f32
    %102 = vector.broadcast %cst_66 : f32 to vector<8x1xf32>
    %103 = arith.divf %101, %102 : vector<8x1xf32>
    %104 = vector.broadcast %103 : vector<8x1xf32> to vector<8x32xf32>
    %105 = arith.subf %99, %104 : vector<8x32xf32>
    %106 = arith.mulf %105, %105 : vector<8x32xf32>
    %cst_67 = arith.constant dense<0.000000e+00> : vector<8xf32>
    %107 = vector.multi_reduction <add>, %106, %cst_67 [1] : vector<8x32xf32> to vector<8xf32>
    %108 = vector.shape_cast %107 : vector<8xf32> to vector<8x1xf32>
    %cst_68 = arith.constant 3.100000e+01 : f32
    %109 = vector.broadcast %cst_68 : f32 to vector<8x1xf32>
    %110 = arith.divf %108, %109 : vector<8x1xf32>
    %111 = math.sqrt %110 : vector<8x1xf32>
    %112 = vector.broadcast %4 : vector<1x32xf32> to vector<8x32xf32>
    %113 = arith.mulf %112, %105 : vector<8x32xf32>
    %cst_69 = arith.constant 9.99999997E-7 : f32
    %114 = vector.broadcast %cst_69 : f32 to vector<8x1xf32>
    %115 = arith.addf %111, %114 : vector<8x1xf32>
    %116 = vector.broadcast %115 : vector<8x1xf32> to vector<8x32xf32>
    %117 = arith.divf %113, %116 : vector<8x32xf32>
    %118 = vector.broadcast %5 : vector<1x32xf32> to vector<8x32xf32>
    %119 = arith.addf %117, %118 : vector<8x32xf32>
    %120 = vector.shape_cast %119 : vector<8x32xf32> to vector<1x8x32xf32>
    %121 = vector.broadcast %120 : vector<1x8x32xf32> to vector<4x8x32xf32>
    "tpu.trace_start"() <{level = 10 : i32, message = "hsd,hdf->hsf"}> : () -> ()
    %cst_70 = arith.constant dense<0.000000e+00> : vector<4x8x8xf32>
    %122 = tpu.matmul %121, %8, %cst_70 {dimension_numbers = #tpu.dot_dimension_numbers<[2], [1], [1], [2], [0, 0, 0, 1, 1, 2], [0], [0]>} : vector<4x8x32xf32>, vector<4x32x8xf32>, vector<4x8x8xf32> -> vector<4x8x8xf32>
    "tpu.trace_stop"() : () -> ()
    %123 = vector.broadcast %11 : vector<4x1x8xf32> to vector<4x8x8xf32>
    %124 = arith.addf %122, %123 : vector<4x8x8xf32>
    "tpu.trace_start"() <{level = 10 : i32, message = "hsd,hdf->hsf"}> : () -> ()
    %cst_71 = arith.constant dense<0.000000e+00> : vector<4x8x8xf32>
    %125 = tpu.matmul %121, %9, %cst_71 {dimension_numbers = #tpu.dot_dimension_numbers<[2], [1], [1], [2], [0, 0, 0, 1, 1, 2], [0], [0]>} : vector<4x8x32xf32>, vector<4x32x8xf32>, vector<4x8x8xf32> -> vector<4x8x8xf32>
    "tpu.trace_stop"() : () -> ()
    %126 = vector.broadcast %12 : vector<4x1x8xf32> to vector<4x8x8xf32>
    %127 = arith.addf %125, %126 : vector<4x8x8xf32>
    "tpu.trace_start"() <{level = 10 : i32, message = "hsd,hdf->hsf"}> : () -> ()
    %cst_72 = arith.constant dense<0.000000e+00> : vector<4x8x8xf32>
    %128 = tpu.matmul %121, %10, %cst_72 {dimension_numbers = #tpu.dot_dimension_numbers<[2], [1], [1], [2], [0, 0, 0, 1, 1, 2], [0], [0]>} : vector<4x8x32xf32>, vector<4x32x8xf32>, vector<4x8x8xf32> -> vector<4x8x8xf32>
    "tpu.trace_stop"() : () -> ()
    %129 = vector.broadcast %13 : vector<4x1x8xf32> to vector<4x8x8xf32>
    %130 = arith.addf %128, %129 : vector<4x8x8xf32>
    "tpu.trace_start"() <{level = 10 : i32, message = "hqd,hkd->hqk"}> : () -> ()
    %cst_73 = arith.constant dense<0.000000e+00> : vector<4x8x8xf32>
    %131 = tpu.matmul %124, %127, %cst_73 {dimension_numbers = #tpu.dot_dimension_numbers<[2], [2], [1], [1], [0, 0, 0, 1, 1, 1], [0], [0]>} : vector<4x8x8xf32>, vector<4x8x8xf32>, vector<4x8x8xf32> -> vector<4x8x8xf32>
    "tpu.trace_stop"() : () -> ()
    %132 = vector.shape_cast %3 : vector<1x8xf32> to vector<1x1x8xf32>
    %133 = vector.broadcast %132 : vector<1x1x8xf32> to vector<4x8x8xf32>
    %134 = arith.addf %131, %133 : vector<4x8x8xf32>
    %cst_74 = arith.constant dense<0xFF800000> : vector<4x8xf32>
    %135 = vector.multi_reduction <maximumf>, %134, %cst_74 [2] : vector<4x8x8xf32> to vector<4x8xf32>
    %136 = vector.shape_cast %135 : vector<4x8xf32> to vector<4x8x1xf32>
    %137 = vector.broadcast %136 : vector<4x8x1xf32> to vector<4x8x8xf32>
    %138 = arith.subf %134, %137 : vector<4x8x8xf32>
    %139 = math.exp %138 : vector<4x8x8xf32>
    %cst_75 = arith.constant dense<0.000000e+00> : vector<4x8xf32>
    %140 = vector.multi_reduction <add>, %139, %cst_75 [2] : vector<4x8x8xf32> to vector<4x8xf32>
    %141 = vector.shape_cast %140 : vector<4x8xf32> to vector<4x8x1xf32>
    %142 = tpu.reciprocal %141 {approx = true} : vector<4x8x1xf32> -> vector<4x8x1xf32>
    %143 = vector.broadcast %142 : vector<4x8x1xf32> to vector<4x8x8xf32>
    %144 = arith.mulf %139, %143 : vector<4x8x8xf32>
    "tpu.trace_start"() <{level = 10 : i32, message = "hqk,hkd->hqd"}> : () -> ()
    %cst_76 = arith.constant dense<0.000000e+00> : vector<4x8x8xf32>
    %145 = tpu.matmul %144, %130, %cst_76 {dimension_numbers = #tpu.dot_dimension_numbers<[2], [1], [1], [2], [0, 0, 0, 1, 1, 2], [0], [0]>} : vector<4x8x8xf32>, vector<4x8x8xf32>, vector<4x8x8xf32> -> vector<4x8x8xf32>
    "tpu.trace_stop"() : () -> ()
    "tpu.trace_start"() <{level = 10 : i32, message = "hsd,hde->hse"}> : () -> ()
    %cst_77 = arith.constant dense<0.000000e+00> : vector<4x8x32xf32>
    %146 = tpu.matmul %145, %14, %cst_77 {dimension_numbers = #tpu.dot_dimension_numbers<[2], [1], [1], [2], [0, 0, 0, 1, 1, 2], [0], [0]>} : vector<4x8x8xf32>, vector<4x8x32xf32>, vector<4x8x32xf32> -> vector<4x8x32xf32>
    "tpu.trace_stop"() : () -> ()
    %cst_78 = arith.constant dense<0.000000e+00> : vector<8x32xf32>
    %147 = vector.multi_reduction <add>, %146, %cst_78 [0] : vector<4x8x32xf32> to vector<8x32xf32>
    %148 = vector.broadcast %15 : vector<1x32xf32> to vector<8x32xf32>
    %149 = arith.addf %147, %148 : vector<8x32xf32>
    %150 = arith.addf %99, %149 : vector<8x32xf32>
    %cst_79 = arith.constant dense<0.000000e+00> : vector<8xf32>
    %151 = vector.multi_reduction <add>, %150, %cst_79 [1] : vector<8x32xf32> to vector<8xf32>
    %152 = vector.shape_cast %151 : vector<8xf32> to vector<8x1xf32>
    %cst_80 = arith.constant 3.200000e+01 : f32
    %153 = vector.broadcast %cst_80 : f32 to vector<8x1xf32>
    %154 = arith.divf %152, %153 : vector<8x1xf32>
    %155 = vector.broadcast %154 : vector<8x1xf32> to vector<8x32xf32>
    %156 = arith.subf %150, %155 : vector<8x32xf32>
    %157 = arith.mulf %156, %156 : vector<8x32xf32>
    %cst_81 = arith.constant dense<0.000000e+00> : vector<8xf32>
    %158 = vector.multi_reduction <add>, %157, %cst_81 [1] : vector<8x32xf32> to vector<8xf32>
    %159 = vector.shape_cast %158 : vector<8xf32> to vector<8x1xf32>
    %cst_82 = arith.constant 3.100000e+01 : f32
    %160 = vector.broadcast %cst_82 : f32 to vector<8x1xf32>
    %161 = arith.divf %159, %160 : vector<8x1xf32>
    %162 = math.sqrt %161 : vector<8x1xf32>
    %163 = vector.broadcast %6 : vector<1x32xf32> to vector<8x32xf32>
    %164 = arith.mulf %163, %156 : vector<8x32xf32>
    %cst_83 = arith.constant 9.99999997E-7 : f32
    %165 = vector.broadcast %cst_83 : f32 to vector<8x1xf32>
    %166 = arith.addf %162, %165 : vector<8x1xf32>
    %167 = vector.broadcast %166 : vector<8x1xf32> to vector<8x32xf32>
    %168 = arith.divf %164, %167 : vector<8x32xf32>
    %169 = vector.broadcast %7 : vector<1x32xf32> to vector<8x32xf32>
    %170 = arith.addf %168, %169 : vector<8x32xf32>
    %cst_84 = arith.constant dense<0.000000e+00> : vector<8x64xf32>
    %171 = tpu.matmul %170, %16, %cst_84 {dimension_numbers = #tpu.dot_dimension_numbers<[1], [0], [0], [1], [0, 0, 1, 1], [], []>} : vector<8x32xf32>, vector<32x64xf32>, vector<8x64xf32> -> vector<8x64xf32>
    %172 = vector.broadcast %17 : vector<1x64xf32> to vector<8x64xf32>
    %173 = arith.addf %171, %172 : vector<8x64xf32>
    %cst_85 = arith.constant 0.000000e+00 : f32
    %174 = vector.broadcast %cst_85 : f32 to vector<8x64xf32>
    %175 = arith.maximumf %173, %174 : vector<8x64xf32>
    %cst_86 = arith.constant dense<0.000000e+00> : vector<8x32xf32>
    %176 = tpu.matmul %175, %18, %cst_86 {dimension_numbers = #tpu.dot_dimension_numbers<[1], [0], [0], [1], [0, 0, 1, 1], [], []>} : vector<8x64xf32>, vector<64x32xf32>, vector<8x32xf32> -> vector<8x32xf32>
    %177 = arith.addf %150, %176 : vector<8x32xf32>
    %178 = vector.broadcast %19 : vector<1x32xf32> to vector<8x32xf32>
    %179 = arith.addf %177, %178 : vector<8x32xf32>
    %c0_87 = arith.constant 0 : index
    %c0_88 = arith.constant 0 : index
    %180 = vector.load %arg19[%c0_87, %c0_88] : memref<1x32xf32, #tpu.memory_space<vmem>>, vector<1x32xf32>
    %c0_89 = arith.constant 0 : index
    %c0_90 = arith.constant 0 : index
    %181 = vector.load %arg20[%c0_89, %c0_90] : memref<1x32xf32, #tpu.memory_space<vmem>>, vector<1x32xf32>
    %cst_91 = arith.constant dense<0.000000e+00> : vector<8xf32>
    %182 = vector.multi_reduction <add>, %179, %cst_91 [1] : vector<8x32xf32> to vector<8xf32>
    %183 = vector.shape_cast %182 : vector<8xf32> to vector<8x1xf32>
    %cst_92 = arith.constant 3.200000e+01 : f32
    %184 = vector.broadcast %cst_92 : f32 to vector<8x1xf32>
    %185 = arith.divf %183, %184 : vector<8x1xf32>
    %186 = vector.broadcast %185 : vector<8x1xf32> to vector<8x32xf32>
    %187 = arith.subf %179, %186 : vector<8x32xf32>
    %188 = arith.mulf %187, %187 : vector<8x32xf32>
    %cst_93 = arith.constant dense<0.000000e+00> : vector<8xf32>
    %189 = vector.multi_reduction <add>, %188, %cst_93 [1] : vector<8x32xf32> to vector<8xf32>
    %190 = vector.shape_cast %189 : vector<8xf32> to vector<8x1xf32>
    %cst_94 = arith.constant 3.100000e+01 : f32
    %191 = vector.broadcast %cst_94 : f32 to vector<8x1xf32>
    %192 = arith.divf %190, %191 : vector<8x1xf32>
    %193 = math.sqrt %192 : vector<8x1xf32>
    %194 = vector.broadcast %180 : vector<1x32xf32> to vector<8x32xf32>
    %195 = arith.mulf %194, %187 : vector<8x32xf32>
    %cst_95 = arith.constant 9.99999997E-7 : f32
    %196 = vector.broadcast %cst_95 : f32 to vector<8x1xf32>
    %197 = arith.addf %193, %196 : vector<8x1xf32>
    %198 = vector.broadcast %197 : vector<8x1xf32> to vector<8x32xf32>
    %199 = arith.divf %195, %198 : vector<8x32xf32>
    %200 = vector.broadcast %181 : vector<1x32xf32> to vector<8x32xf32>
    %201 = arith.addf %199, %200 : vector<8x32xf32>
    %c0_96 = arith.constant 0 : index
    %c0_97 = arith.constant 0 : index
    %c0_98 = arith.constant 0 : index
    %202 = vector.load %arg21[%c0_96, %c0_97, %c0_98] : memref<1x8x32xf32, #tpu.memory_space<vmem>>, vector<1x8x32xf32>
    %203 = vector.shape_cast %202 : vector<1x8x32xf32> to vector<8x32xf32>
    %204 = vector.shape_cast %201 : vector<8x32xf32> to vector<1x8x32xf32>
    tpu.vector_store %arg21[%c0_96, %c0_97, %c0_98], %204 {strides = array<i32>} : memref<1x8x32xf32, #tpu.memory_space<vmem>>, vector<1x8x32xf32>,
    return
  }
  func.func @transform_0(%arg0: i32) -> (i32, i32, i32) {
    %c0_i32 = arith.constant 0 : i32
    %c0_i32_0 = arith.constant 0 : i32
    %c0_i32_1 = arith.constant 0 : i32
    return %arg0, %c0_i32, %c0_i32_0 : i32, i32, i32
  }
  func.func @transform_1(%arg0: i32) -> (i32, i32, i32) {
    %c0_i32 = arith.constant 0 : i32
    %c0_i32_0 = arith.constant 0 : i32
    %c0_i32_1 = arith.constant 0 : i32
    return %arg0, %c0_i32, %c0_i32_0 : i32, i32, i32
  }
  func.func @transform_2(%arg0: i32) -> (i32, i32) {
    %c0_i32 = arith.constant 0 : i32
    %c0_i32_0 = arith.constant 0 : i32
    %c0_i32_1 = arith.constant 0 : i32
    return %c0_i32, %c0_i32_0 : i32, i32
  }
  func.func @transform_3(%arg0: i32) -> (i32, i32) {
    %c0_i32 = arith.constant 0 : i32
    %c0_i32_0 = arith.constant 0 : i32
    %c0_i32_1 = arith.constant 0 : i32
    return %c0_i32, %c0_i32_0 : i32, i32
  }
  func.func @transform_4(%arg0: i32) -> (i32, i32) {
    %c0_i32 = arith.constant 0 : i32
    %c0_i32_0 = arith.constant 0 : i32
    %c0_i32_1 = arith.constant 0 : i32
    return %c0_i32, %c0_i32_0 : i32, i32
  }
  func.func @transform_5(%arg0: i32) -> (i32, i32) {
    %c0_i32 = arith.constant 0 : i32
    %c0_i32_0 = arith.constant 0 : i32
    %c0_i32_1 = arith.constant 0 : i32
    return %c0_i32, %c0_i32_0 : i32, i32
  }
  func.func @transform_6(%arg0: i32) -> (i32, i32, i32) {
    %c0_i32 = arith.constant 0 : i32
    %c0_i32_0 = arith.constant 0 : i32
    %c0_i32_1 = arith.constant 0 : i32
    %c0_i32_2 = arith.constant 0 : i32
    return %c0_i32, %c0_i32_0, %c0_i32_1 : i32, i32, i32
  }
  func.func @transform_7(%arg0: i32) -> (i32, i32, i32) {
    %c0_i32 = arith.constant 0 : i32
    %c0_i32_0 = arith.constant 0 : i32
    %c0_i32_1 = arith.constant 0 : i32
    %c0_i32_2 = arith.constant 0 : i32
    return %c0_i32, %c0_i32_0, %c0_i32_1 : i32, i32, i32
  }
  func.func @transform_8(%arg0: i32) -> (i32, i32, i32) {
    %c0_i32 = arith.constant 0 : i32
    %c0_i32_0 = arith.constant 0 : i32
    %c0_i32_1 = arith.constant 0 : i32
    %c0_i32_2 = arith.constant 0 : i32
    return %c0_i32, %c0_i32_0, %c0_i32_1 : i32, i32, i32
  }
  func.func @transform_9(%arg0: i32) -> (i32, i32, i32) {
    %c0_i32 = arith.constant 0 : i32
    %c0_i32_0 = arith.constant 0 : i32
    %c0_i32_1 = arith.constant 0 : i32
    %c0_i32_2 = arith.constant 0 : i32
    return %c0_i32, %c0_i32_0, %c0_i32_1 : i32, i32, i32
  }
  func.func @transform_10(%arg0: i32) -> (i32, i32, i32) {
    %c0_i32 = arith.constant 0 : i32
    %c0_i32_0 = arith.constant 0 : i32
    %c0_i32_1 = arith.constant 0 : i32
    %c0_i32_2 = arith.constant 0 : i32
    return %c0_i32, %c0_i32_0, %c0_i32_1 : i32, i32, i32
  }
  func.func @transform_11(%arg0: i32) -> (i32, i32, i32) {
    %c0_i32 = arith.constant 0 : i32
    %c0_i32_0 = arith.constant 0 : i32
    %c0_i32_1 = arith.constant 0 : i32
    %c0_i32_2 = arith.constant 0 : i32
    return %c0_i32, %c0_i32_0, %c0_i32_1 : i32, i32, i32
  }
  func.func @transform_12(%arg0: i32) -> (i32, i32, i32) {
    %c0_i32 = arith.constant 0 : i32
    %c0_i32_0 = arith.constant 0 : i32
    %c0_i32_1 = arith.constant 0 : i32
    %c0_i32_2 = arith.constant 0 : i32
    return %c0_i32, %c0_i32_0, %c0_i32_1 : i32, i32, i32
  }
  func.func @transform_13(%arg0: i32) -> (i32, i32) {
    %c0_i32 = arith.constant 0 : i32
    %c0_i32_0 = arith.constant 0 : i32
    %c0_i32_1 = arith.constant 0 : i32
    return %c0_i32, %c0_i32_0 : i32, i32
  }
  func.func @transform_14(%arg0: i32) -> (i32, i32) {
    %c0_i32 = arith.constant 0 : i32
    %c0_i32_0 = arith.constant 0 : i32
    %c0_i32_1 = arith.constant 0 : i32
    return %c0_i32, %c0_i32_0 : i32, i32
  }
  func.func @transform_15(%arg0: i32) -> (i32, i32) {
    %c0_i32 = arith.constant 0 : i32
    %c0_i32_0 = arith.constant 0 : i32
    %c0_i32_1 = arith.constant 0 : i32
    return %c0_i32, %c0_i32_0 : i32, i32
  }
  func.func @transform_16(%arg0: i32) -> (i32, i32) {
    %c0_i32 = arith.constant 0 : i32
    %c0_i32_0 = arith.constant 0 : i32
    %c0_i32_1 = arith.constant 0 : i32
    return %c0_i32, %c0_i32_0 : i32, i32
  }
  func.func @transform_17(%arg0: i32) -> (i32, i32) {
    %c0_i32 = arith.constant 0 : i32
    %c0_i32_0 = arith.constant 0 : i32
    %c0_i32_1 = arith.constant 0 : i32
    return %c0_i32, %c0_i32_0 : i32, i32
  }
  func.func @transform_18(%arg0: i32) -> (i32, i32) {
    %c0_i32 = arith.constant 0 : i32
    %c0_i32_0 = arith.constant 0 : i32
    %c0_i32_1 = arith.constant 0 : i32
    return %c0_i32, %c0_i32_0 : i32, i32
  }
  func.func @transform_19(%arg0: i32) -> (i32, i32) {
    %c0_i32 = arith.constant 0 : i32
    %c0_i32_0 = arith.constant 0 : i32
    %c0_i32_1 = arith.constant 0 : i32
    return %c0_i32, %c0_i32_0 : i32, i32
  }
  func.func @transform_20(%arg0: i32) -> (i32, i32, i32) {
    %c0_i32 = arith.constant 0 : i32
    %c0_i32_0 = arith.constant 0 : i32
    %c0_i32_1 = arith.constant 0 : i32
    return %arg0, %c0_i32, %c0_i32_0 : i32, i32, i32
  }
}

</mosaic_0001>

<bundles_post_ra>
// kernel: encoder_forward.1
= control target key start
LH: loop header
LB: loop body
LE: loop exit
PB: predicated region body
PF: predicated region fallthrough
CT: control target
= control target key end

     0   :  { %s7885_s0 = inlined_call_operand.hbm [shape: f32[2,8,32], index: 0, kind: input, shape index: {}]   ;;  %s7886_s1 = inlined_call_operand.vmem [shape: f32[2,1,8], index: 1, kind: input, shape index: {}]   ;;  %s7887_s2 = inlined_call_operand.vmem [shape: f32[1,32], index: 2, kind: input, shape index: {}, may-alias: {2,4,18}]   ;;  %s7888_s3 = inlined_call_operand.vmem [shape: f32[1,32], index: 3, kind: input, shape index: {}, may-alias: {3,5,19}]   ;;  %s7889_s4 = inlined_call_operand.vmem [shape: f32[1,32], index: 4, kind: input, shape index: {}, may-alias: {2,4,18}]   ;;  %s7890_s5 = inlined_call_operand.vmem [shape: f32[1,32], index: 5, kind: input, shape index: {}, may-alias: {3,5,19}]   ;;  %s7891_s6 = inlined_call_operand.hbm [shape: f32[4,32,8], index: 6, kind: input, shape index: {}]   ;;  %s7892_s7 = inlined_call_operand.hbm [shape: f32[4,32,8], index: 7, kind: input, shape index: {}]   ;;  %s7893_s8 = inlined_call_operand.hbm [shape: f32[4,32,8], index: 8, kind: input, shape index: {}]   ;;  %s7894_s9 = inlined_call_operand.hbm [shape: f32[4,1,8], index: 9, kind: input, shape index: {}]   ;;  %s7895_s10 = inlined_call_operand.hbm [shape: f32[4,1,8], index: 10, kind: input, shape index: {}]   ;;  %s7896_s11 = inlined_call_operand.hbm [shape: f32[4,1,8], index: 11, kind: input, shape index: {}]   ;;  %s7897_s12 = inlined_call_operand.hbm [shape: f32[4,8,32], index: 12, kind: input, shape index: {}]   ;;  %s7898_s13 = inlined_call_operand.hbm [shape: f32[1,32], index: 13, kind: input, shape index: {}]   ;;  %s7899_s14 = inlined_call_operand.hbm [shape: f32[32,64], index: 14, kind: input, shape index: {}]   ;;  %s7900_s15 = inlined_call_operand.hbm [shape: f32[1,64], index: 15, kind: input, shape index: {}]   ;;  %s7901_s16 = inlined_call_operand.vmem [shape: f32[64,32], index: 16, kind: input, shape index: {}]   ;;  %s7902_s17 = inlined_call_operand.vmem [shape: f32[1,32], index: 17, kind: input, shape index: {}]   ;;  %s7903_s18 = inlined_call_operand.vmem [shape: f32[1,32], index: 18, kind: input, shape index: {}, may-alias: {2,4,18}]   ;;  %s7904_s19 = inlined_call_operand.vmem [shape: f32[1,32], index: 19, kind: input, shape index: {}, may-alias: {3,5,19}]   ;;  %s7905_s20 = inlined_call_operand.hbm [shape: f32[2,8,32], index: 20, kind: output, shape index: {}]  }
   0x1   :  { %7926 = sst [smem:[#allocation31_spill]] %s7885_s0 }
   0x2   :  { %7927 = sst [smem:[#allocation32_spill]] %s7886_s1 }
   0x3   :  { %7928 = sst [smem:[#allocation33_spill]] %s7887_s2 }
   0x4   :  { %7929 = sst [smem:[#allocation34_spill]] %s7888_s3 }
   0x5   :  { %7930 = sst [smem:[#allocation35_spill]] %s7889_s4 }
   0x6   :  { %7931 = sst [smem:[#allocation36_spill]] %s7890_s5 }
   0x7   :  { %7932 = sst [smem:[#allocation37_spill]] %s7891_s6 }
   0x8   :  { %7933 = sst [smem:[#allocation38_spill]] %s7892_s7 }
   0x9   :  { %7934 = sst [smem:[#allocation39_spill]] %s7893_s8 }
   0xa   :  { %7935 = sst [smem:[#allocation40_spill]] %s7894_s9 }
   0xb   :  { %7936 = sst [smem:[#allocation41_spill]] %s7901_s16 }
   0xc   :  { %7937 = sst [smem:[#allocation42_spill]] %s7902_s17 }
   0xd   :  { %7938 = sst [smem:[#allocation43_spill]] %s7903_s18 }
   0xe   :  { %7939 = sst [smem:[#allocation44_spill]] %s7904_s19 }
   0xf   :  { %7940 = sst [smem:[#allocation45_spill]] %s7905_s20 }
  0x10   :  { %25 = vsyncpa [#allocation3], 0 }
  0x11   :  { %27 = vsyncpa [#allocation3 + $0x1], 0 }
  0x12   :  { %28 = vsyncpa [#allocation6], 0 }
  0x13   :  { %29 = vsyncpa [#allocation9], 0 }
  0x14   :  { %30 = vsyncpa [#allocation12], 0 }
  0x15   :  { %31 = vsyncpa [#allocation15], 0 }
  0x16   :  { %32 = vsyncpa [#allocation18], 0 }
  0x17   :  { %33 = vsyncpa [#allocation4], 0 }
  0x18   :  { %35 = vsyncpa [#allocation4 + $0x1], 0  ;;  %s6851_s1 = smov 0   ;;  %s6853_s22 = smov 0  }
  0x19   :  { %s6855_s23 = smov 0   ;;  %s6857_s24 = smov 0  }
  0x1a LB: > { %s6727_s2 = smov [#allocation5]   ;;  %s6872_s3 = sadd.s32 4294967295, %s6725_s24   ;;  %s6725_s24 = sphi %s6857_s24, %s7993_s24   ;;  %s6721_s23 = sphi %s6855_s23, %s7992_s23   ;;  %s6717_s22 = sphi %s6853_s22, %s7991_s22   ;;  %s6713_s1 = sphi %s6851_s1, %s7990_s1  }
  0x1b   : > { %s526_s25 = sshll.u32 %s6727_s2, 4  ;;  %p5190_p0 = scmp.ge.s32.totalorder %s6725_s24, 1  ;;  %s6877_s25 = int_to_ptr.vmem [resolvable:$true] %s526_s25 }
  0x1c   : > { %p7910_p1 = scmp.eq.s32.totalorder %s6872_s3, 0  ;;  %p502_p2 = scmp.lt.s32.totalorder %s6725_s24, 3 }
  0x1d   : > { %s6728_s27 = smov [#allocation8]   ;;  %s6729_s29 = smov [#allocation11]  }
  0x1e   : > { %p6879_p3 = pnand %p5190_p0, %p502_p2  ;;  %s552_s28 = sshll.u32 %s6728_s27, 4  ;;  %s6892_s28 = int_to_ptr.vmem [resolvable:$true] %s552_s28 }
  0x1f   : > { %s6894_s30 = sshll.u32 %s6729_s29, 4  ;;  %s7944_s6 = sld [smem:[#allocation37_spill]]  ;;  %s579_s30 = int_to_ptr.vmem [resolvable:$true] %s6894_s30 }
  0x20   : > { %s7941_s26 = scalar_select %p6879_p3, 1, 0 }
  0x21   : > { %p6167_p5 = pneg %p6879_p3 }
  0x22   : > { %7942 = sst [smem:[#allocation28_spill]] %s7941_s26 }
  0x23   : > { %p6888_p6 = pnand %p6167_p5, %p7910_p1 }
  0x25   : > { %s6329_s2 = scalar_lea.hbm %s7944_s6, 2048  ;;  %p6904_p8 = pneg %p6888_p6 }
  0x26   : > { %p6330_p7 = scmp.ne.s32.totalorder %s7944_s6, %s6329_s2  ;;  %p6336_p11 = scmp.lt.u32.totalorder %s6329_s2, %s7944_s6 }
  0x28   : > { %p6332_p9 = pnand %p6904_p8, %p6330_p7 }
  0x2a   : > { %p6333_p10 = pneg %p6332_p9 }
  0x2c   : > { %p6338_p12 = pnand %p6336_p11, %p6333_p10 }
  0x2e   : > { %6341 = shalt.err (!%p6338_p12)
}
  0x2f   : > { %s6342_s19 = scalar_lea.vmem %s6877_s25, 2048  ;;  %p6350_p5 = scmp.lt.s32.totalorder %s6877_s25, %s6877_s25 }
  0x30   : > { %p6343_p13 = scmp.ne.s32.totalorder %s6877_s25, %s6342_s19  ;;  %p6351_p4 = scmp.lt.s32.totalorder %s6342_s19, %s6342_s19 }
  0x32   : > { %p6345_p0 = pnand %p6343_p13, %p6904_p8  ;;  %p6352_p7 = por %p6351_p4, %p6350_p5 }
  0x34   : > { %p6346_p2 = pneg %p6345_p0 }
  0x36   : > { %p6353_p9 = pnand %p6352_p7, %p6346_p2 }
  0x38   : > { %6356 = shalt.err (!%p6353_p9)
}
  0x39   : > { %s7912_s20 = smov 128   ;;  %s7914_s18 = smov 8  }
  0x3a   : > { %6170 = dma.hbm_to_vmem [thread:$0]  (!%p6888_p6), %s7944_s6, 2048, %s6877_s25, [#allocation6], %s7912_s20, %s7912_s20, %s7914_s18  }
  0x3b   : > { %s7946_s8 = sld [smem:[#allocation39_spill]] }
  0x41   : > { %s6357_s19 = scalar_lea.hbm %s7946_s8, 2048 }
  0x42   : > { %p6358_p4 = scmp.ne.s32.totalorder %s7946_s8, %s6357_s19  ;;  %p6364_p12 = scmp.lt.u32.totalorder %s6357_s19, %s7946_s8 }
  0x44   : > { %p6360_p10 = pnand %p6358_p4, %p6904_p8 }
  0x46   : > { %p6361_p11 = pneg %p6360_p10 }
  0x48   : > { %p6366_p13 = pnand %p6364_p12, %p6361_p11 }
  0x4a   : > { %6369 = shalt.err (!%p6366_p13)
}
  0x4b   : > { %s6370_s25 = scalar_lea.vmem %s6892_s28, 2048  ;;  %p6378_p7 = scmp.lt.s32.totalorder %s6892_s28, %s6892_s28 }
  0x4c   : > { %p6371_p0 = scmp.ne.s32.totalorder %s6892_s28, %s6370_s25  ;;  %p6379_p9 = scmp.lt.s32.totalorder %s6370_s25, %s6370_s25 }
  0x4e   : > { %p6373_p2 = pnand %p6371_p0, %p6904_p8  ;;  %p6380_p4 = por %p6379_p9, %p6378_p7 }
  0x50   : > { %p6374_p5 = pneg %p6373_p2 }
  0x52   : > { %p6381_p10 = pnand %p6380_p4, %p6374_p5 }
  0x54   : > { %6384 = shalt.err (!%p6381_p10)
}
  0x55   : > { %6176 = dma.hbm_to_vmem [thread:$0]  (!%p6888_p6), %s7946_s8, 2048, %s6892_s28, [#allocation9], %s7912_s20, %s7912_s20, %s7914_s18  }
  0x56   : > { %s6385_s0 = scalar_lea.hbm %s7895_s10, 64 }
  0x57   : > { %p6386_p11 = scmp.ne.s32.totalorder %s7895_s10, %s6385_s0  ;;  %p6392_p0 = scmp.lt.u32.totalorder %s6385_s0, %s7895_s10 }
  0x59   : > { %p6388_p12 = pnand %p6386_p11, %p6904_p8 }
  0x5b   : > { %p6389_p13 = pneg %p6388_p12 }
  0x5d   : > { %p6394_p2 = pnand %p6392_p0, %p6389_p13 }
  0x5f   : > { %6397 = shalt.err (!%p6394_p2)
}
  0x60   : > { %s6398_s25 = scalar_lea.vmem %s579_s30, 64  ;;  %p6406_p4 = scmp.lt.s32.totalorder %s579_s30, %s579_s30 }
  0x61   : > { %p6399_p5 = scmp.ne.s32.totalorder %s579_s30, %s6398_s25  ;;  %p6407_p10 = scmp.lt.s32.totalorder %s6398_s25, %s6398_s25 }
  0x63   : > { %p6401_p7 = pnand %p6399_p5, %p6904_p8  ;;  %p6408_p1 = por %p6407_p10, %p6406_p4 }
  0x65   : > { %p6402_p9 = pneg %p6401_p7 }
  0x67   : > { %p6409_p3 = pnand %p6408_p1, %p6402_p9 }
  0x69   : > { %6412 = shalt.err (!%p6409_p3)
}
  0x6a   : > { %s7916_s28 = smov 16   ;;  %s6733_s5 = smov 1  }
  0x6b   : > { %6182 = dma.hbm_to_vmem [thread:$0]  (!%p6888_p6), %s7895_s10, 64, %s579_s30, [#allocation12], %s7916_s28, %s7916_s28, %s6733_s5  }
  0x6c   : > { %s6734_s26 = smov [#allocation14]   ;;  %s6735_s21 = smov [#allocation17]  }
  0x6d   : > { %s604_s0 = sshll.u32 %s6734_s26, 4  ;;  %s628_s2 = sshll.u32 %s6735_s21, 4  ;;  %s605_s0 = int_to_ptr.vmem [resolvable:$true] %s604_s0  ;;  %s629_s2 = int_to_ptr.vmem [resolvable:$true] %s628_s2 }
  0x6e   : > { %s6413_s25 = scalar_lea.hbm %s7897_s12, 512 }
  0x6f   : > { %p6414_p1 = scmp.ne.s32.totalorder %s7897_s12, %s6413_s25  ;;  %p6420_p12 = scmp.lt.u32.totalorder %s6413_s25, %s7897_s12 }
  0x71   : > { %p6416_p3 = pnand %p6414_p1, %p6904_p8 }
  0x73   : > { %p6417_p11 = pneg %p6416_p3 }
  0x75   : > { %p6422_p13 = pnand %p6420_p12, %p6417_p11 }
  0x77   : > { %6425 = shalt.err (!%p6422_p13)
}
  0x78   : > { %s6426_s30 = scalar_lea.vmem %s605_s0, 512  ;;  %p6434_p7 = scmp.lt.s32.totalorder %s605_s0, %s605_s0 }
  0x79   : > { %p6427_p0 = scmp.ne.s32.totalorder %s605_s0, %s6426_s30  ;;  %p6435_p9 = scmp.lt.s32.totalorder %s6426_s30, %s6426_s30 }
  0x7b   : > { %p6429_p2 = pnand %p6427_p0, %p6904_p8  ;;  %p6436_p4 = por %p6435_p9, %p6434_p7 }
  0x7d   : > { %p6430_p5 = pneg %p6429_p2 }
  0x7f   : > { %p6437_p10 = pnand %p6436_p4, %p6430_p5 }
  0x81   : > { %6440 = shalt.err (!%p6437_p10)
}
  0x82   : > { %s7947_s20 = smov 8   ;;  %s7948_s18 = smov 128  }
  0x83   : > { %6188 = dma.hbm_to_vmem [thread:$0]  (!%p6888_p6), %s7897_s12, 512, %s605_s0, [#allocation15], %s7948_s18, %s7948_s18, %s7947_s20  }
  0x84   : > { %s6441_s26 = scalar_lea.hbm %s7899_s14, 512 }
  0x85   : > { %p6442_p1 = scmp.ne.s32.totalorder %s7899_s14, %s6441_s26  ;;  %p6448_p12 = scmp.lt.u32.totalorder %s6441_s26, %s7899_s14 }
  0x87   : > { %p6444_p3 = pnand %p6442_p1, %p6904_p8 }
  0x89   : > { %p6445_p11 = pneg %p6444_p3 }
  0x8b   : > { %p6450_p13 = pnand %p6448_p12, %p6445_p11 }
  0x8d   : > { %6453 = shalt.err (!%p6450_p13)
}
  0x8e   : > { %s6454_s30 = scalar_lea.vmem %s629_s2, 512  ;;  %p6462_p7 = scmp.lt.s32.totalorder %s629_s2, %s629_s2 }
  0x8f   : > { %p6455_p0 = scmp.ne.s32.totalorder %s629_s2, %s6454_s30  ;;  %p6463_p9 = scmp.lt.s32.totalorder %s6454_s30, %s6454_s30 }
  0x91   : > { %p6457_p2 = pnand %p6455_p0, %p6904_p8  ;;  %p6464_p4 = por %p6463_p9, %p6462_p7 }
  0x93   : > { %p6458_p5 = pneg %p6457_p2 }
  0x95   : > { %p6465_p10 = pnand %p6464_p4, %p6458_p5 }
  0x97   : > { %6468 = shalt.err (!%p6465_p10)
}
  0x98   : > { %6194 = dma.hbm_to_vmem [thread:$0]  (!%p6888_p6), %s7899_s14, 512, %s629_s2, [#allocation18], %s7948_s18, %s7948_s18, %s7947_s20  }
  0x99   : > { %s6736_s8 = smov [#allocation7]   ;;  %s6737_s17 = smov [#allocation10]  }
  0x9a   : > { %s539_s16 = sshll.u32 %s6736_s8, 4  ;;  %s565_s26 = sshll.u32 %s6737_s17, 4  ;;  %s540_s16 = int_to_ptr.vmem [resolvable:$true] %s539_s16  ;;  %s566_s26 = int_to_ptr.vmem [resolvable:$true] %s565_s26 }
  0x9b   : > { %s7949_s7 = sld [smem:[#allocation38_spill]] }
  0xa1   : > { %s6469_s19 = scalar_lea.hbm %s7949_s7, 2048 }
  0xa2   : > { %p6470_p1 = scmp.ne.s32.totalorder %s7949_s7, %s6469_s19  ;;  %p6476_p12 = scmp.lt.u32.totalorder %s6469_s19, %s7949_s7 }
  0xa4   : > { %p6472_p3 = pnand %p6470_p1, %p6904_p8 }
  0xa6   : > { %p6473_p11 = pneg %p6472_p3 }
  0xa8   : > { %p6478_p13 = pnand %p6476_p12, %p6473_p11 }
  0xaa   : > { %6481 = shalt.err (!%p6478_p13)
}
  0xab   : > { %s6482_s2 = scalar_lea.vmem %s540_s16, 2048  ;;  %p6490_p7 = scmp.lt.s32.totalorder %s540_s16, %s540_s16 }
  0xac   : > { %p6483_p0 = scmp.ne.s32.totalorder %s540_s16, %s6482_s2  ;;  %p6491_p9 = scmp.lt.s32.totalorder %s6482_s2, %s6482_s2 }
  0xae   : > { %p6485_p2 = pnand %p6483_p0, %p6904_p8  ;;  %p6492_p4 = por %p6491_p9, %p6490_p7 }
  0xb0   : > { %p6486_p5 = pneg %p6485_p2 }
  0xb2   : > { %p6493_p10 = pnand %p6492_p4, %p6486_p5 }
  0xb4   : > { %6496 = shalt.err (!%p6493_p10)
}
  0xb5   : > { %6173 = dma.hbm_to_vmem [thread:$0]  (!%p6888_p6), %s7949_s7, 2048, %s540_s16, [#allocation6], %s7948_s18, %s7948_s18, %s7947_s20  }
  0xb6   : > { %s7950_s9 = sld [smem:[#allocation40_spill]] }
  0xbc   : > { %s6497_s21 = scalar_lea.hbm %s7950_s9, 64 }
  0xbd   : > { %p6498_p1 = scmp.ne.s32.totalorder %s7950_s9, %s6497_s21  ;;  %p6504_p12 = scmp.lt.u32.totalorder %s6497_s21, %s7950_s9 }
  0xbf   : > { %p6500_p3 = pnand %p6498_p1, %p6904_p8 }
  0xc1   : > { %p6501_p11 = pneg %p6500_p3 }
  0xc3   : > { %p6506_p13 = pnand %p6504_p12, %p6501_p11 }
  0xc5   : > { %6509 = shalt.err (!%p6506_p13)
}
  0xc6   : > { %s6510_s0 = scalar_lea.vmem %s566_s26, 64  ;;  %p6518_p7 = scmp.lt.s32.totalorder %s566_s26, %s566_s26 }
  0xc7   : > { %p6511_p0 = scmp.ne.s32.totalorder %s566_s26, %s6510_s0  ;;  %p6519_p9 = scmp.lt.s32.totalorder %s6510_s0, %s6510_s0 }
  0xc9   : > { %p6513_p2 = pnand %p6511_p0, %p6904_p8  ;;  %p6520_p4 = por %p6519_p9, %p6518_p7 }
  0xcb   : > { %p6514_p5 = pneg %p6513_p2 }
  0xcd   : > { %p6521_p10 = pnand %p6520_p4, %p6514_p5 }
  0xcf   : > { %6524 = shalt.err (!%p6521_p10)
}
  0xd0   : > { %s7951_s20 = smov 16   ;;  %s6738_s2 = smov [#allocation13]  }
  0xd1   : > { %6179 = dma.hbm_to_vmem [thread:$0]  (!%p6888_p6), %s7950_s9, 64, %s566_s26, [#allocation9], %s7951_s20, %s7951_s20, %s6733_s5  }
  0xd2   : > { %s591_s28 = sshll.u32 %s6738_s2, 4  ;;  %s6739_s6 = smov [#allocation16]   ;;  %s592_s28 = int_to_ptr.vmem [resolvable:$true] %s591_s28 }
  0xd3   : > { %s618_s8 = sshll.u32 %s6739_s6, 4  ;;  %s6525_s29 = scalar_lea.hbm %s7896_s11, 64  ;;  %s619_s8 = int_to_ptr.vmem [resolvable:$true] %s618_s8 }
  0xd4   : > { %p6526_p1 = scmp.ne.s32.totalorder %s7896_s11, %s6525_s29  ;;  %p6532_p12 = scmp.lt.u32.totalorder %s6525_s29, %s7896_s11 }
  0xd6   : > { %p6528_p3 = pnand %p6526_p1, %p6904_p8 }
  0xd8   : > { %p6529_p11 = pneg %p6528_p3 }
  0xda   : > { %p6534_p13 = pnand %p6532_p12, %p6529_p11 }
  0xdc   : > { %6537 = shalt.err (!%p6534_p13)
}
  0xdd   : > { %s6538_s26 = scalar_lea.vmem %s592_s28, 64  ;;  %p6546_p7 = scmp.lt.s32.totalorder %s592_s28, %s592_s28 }
  0xde   : > { %p6539_p0 = scmp.ne.s32.totalorder %s592_s28, %s6538_s26  ;;  %p6547_p9 = scmp.lt.s32.totalorder %s6538_s26, %s6538_s26 }
  0xe0   : > { %p6541_p2 = pnand %p6539_p0, %p6904_p8  ;;  %p6548_p4 = por %p6547_p9, %p6546_p7 }
  0xe2   : > { %p6542_p5 = pneg %p6541_p2 }
  0xe4   : > { %p6549_p10 = pnand %p6548_p4, %p6542_p5 }
  0xe6   : > { %6552 = shalt.err (!%p6549_p10)
}
  0xe7   : > { %6185 = dma.hbm_to_vmem [thread:$0]  (!%p6888_p6), %s7896_s11, 64, %s592_s28, [#allocation12], %s7951_s20, %s7951_s20, %s6733_s5  }
  0xe8   : > { %s6553_s17 = scalar_lea.hbm %s7898_s13, 16 }
  0xe9   : > { %p6554_p1 = scmp.ne.s32.totalorder %s7898_s13, %s6553_s17  ;;  %p6560_p12 = scmp.lt.u32.totalorder %s6553_s17, %s7898_s13 }
  0xeb   : > { %p6556_p3 = pnand %p6554_p1, %p6904_p8 }
  0xed   : > { %p6557_p11 = pneg %p6556_p3 }
  0xef   : > { %p6562_p13 = pnand %p6560_p12, %p6557_p11 }
  0xf1   : > { %6565 = shalt.err (!%p6562_p13)
}
  0xf2   : > { %s6566_s30 = scalar_lea.vmem %s619_s8, 16  ;;  %s6573_s5 = scalar_lea.vmem %s619_s8, 32 }
  0xf3   : > { %p6567_p0 = scmp.ne.s32.totalorder %s619_s8, %s6566_s30  ;;  %p6574_p7 = scmp.lt.s32.totalorder %s619_s8, %s619_s8 }
  0xf4   : > { %p6575_p9 = scmp.lt.s32.totalorder %s6573_s5, %s6566_s30 }
  0xf5   : > { %p6569_p2 = pnand %p6567_p0, %p6904_p8 }
  0xf6   : > { %p6576_p4 = por %p6575_p9, %p6574_p7 }
  0xf7   : > { %p6570_p5 = pneg %p6569_p2 }
  0xf9   : > { %p6577_p10 = pnand %p6576_p4, %p6570_p5 }
  0xfb   : > { %6580 = shalt.err (!%p6577_p10)
}
  0xfc   : > { %6191 = dma.hbm_to_vmem [thread:$0]  (!%p6888_p6), %s7898_s13, 16, %s619_s8, [#allocation15]  }
  0xfd   : > { %s6740_s0 = smov [#allocation19]   ;;  %s6581_s2 = scalar_lea.hbm %s7900_s15, 16 }
  0xfe   : > { %s642_s26 = sshll.u32 %s6740_s0, 4  ;;  %p6582_p1 = scmp.ne.s32.totalorder %s7900_s15, %s6581_s2  ;;  %s643_s26 = int_to_ptr.vmem [resolvable:$true] %s642_s26 }
  0xff   : > { %p6588_p12 = scmp.lt.u32.totalorder %s6581_s2, %s7900_s15 }
 0x100   : > { %p6584_p3 = pnand %p6582_p1, %p6904_p8 }
 0x102   : > { %p6585_p11 = pneg %p6584_p3 }
 0x104   : > { %p6590_p13 = pnand %p6588_p12, %p6585_p11 }
 0x106   : > { %6593 = shalt.err (!%p6590_p13)
}
 0x107   : > { %s6594_s8 = scalar_lea.vmem %s643_s26, 16  ;;  %s6601_s19 = scalar_lea.vmem %s643_s26, 32 }
 0x108   : > { %p6595_p0 = scmp.ne.s32.totalorder %s643_s26, %s6594_s8  ;;  %p6602_p7 = scmp.lt.s32.totalorder %s643_s26, %s643_s26 }
 0x109   : > { %p6603_p9 = scmp.lt.s32.totalorder %s6601_s19, %s6594_s8 }
 0x10a   : > { %p6597_p2 = pnand %p6595_p0, %p6904_p8 }
 0x10b   : > { %p6604_p4 = por %p6603_p9, %p6602_p7 }
 0x10c   : > { %p6598_p5 = pneg %p6597_p2 }
 0x10e   : > { %p6605_p10 = pnand %p6604_p4, %p6598_p5 }
 0x110   : > { %6608 = shalt.err (!%p6605_p10)
}
 0x111   : > { %6197 = dma.hbm_to_vmem [thread:$0]  (!%p6888_p6), %s7900_s15, 16, %s643_s26, [#allocation18]  }
 0x112   : > { %s5189_s27 = sadd.s32 4294967294, %s6725_s24   ;;  %s7119_s4 = sadd.s32 1, %s6725_s24  }
 0x113   : > { %s45_s5 = ssub.s32 %s6725_s24, %s7119_s4  ;;  %s48_s20 = sadd.s32 1, %s6721_s23 }
 0x114   : > { %p46_p8 = scmp.eq.s32.totalorder %s45_s5, 0  ;;  %p55_p1 = scmp.ne.s32.totalorder %s6721_s23, %s6717_s22 }
 0x115   : > { %p56_p3 = scmp.eq.s32.totalorder %s6725_s24, 0  ;;  %p61_p11 = scmp.ne.s32.totalorder %s6717_s22, %s6713_s1 }
 0x116   : > { %s7130_s28 = scalar_select %p46_p8, %s6721_s23, %s48_s20  }
 0x117   : > { %p7132_p12 = por %p56_p3, %p55_p1  ;;  %p7953_p13 = scmp.eq.s32.totalorder %s6872_s3, 0 }
 0x118   : > { %p489_p0 = scmp.eq.s32.totalorder %s6872_s3, 1  ;;  %p495_p2 = scmp.eq.s32.totalorder %s5189_s27, 1 }
 0x119   : > { %p7138_p6 = por %p7953_p13, %p61_p11  ;;  %p6216_p5 = scmp.lt.s32.totalorder %s6725_s24, 2 }
 0x11a   : > { %s665_s18 = sand.u32 1, %s6721_s23   ;;  %p7145_p7 = por %p489_p0, %p55_p1 }
 0x11b   : > { %p7149_p9 = por %p495_p2, %p61_p11  ;;  %s5202_s6 = sshll.u32 %s665_s18, 3 }
 0x11c   : > { %s7955_s16 = scalar_select %p7145_p7, 1, 0 }
 0x11d   : > { %s7956_s2 = scalar_select %p7149_p9, 1, 0 }
 0x11e   : > { %s5203_s17 = sshll.u32 %s6725_s24, 7  ;;  %s7957_s8 = sld [smem:[#allocation31_spill]] }
 0x11f   : > { %s669_s25 = scalar_lea.vmem [#allocation2], %s5202_s6  ;;  %p7163_p4 = pnand %p6216_p5, %p7132_p12 }
 0x120   : > { %s676_s30 = sshll.u32 %s669_s25, 4  ;;  %s666_s5 = scalar_lea.sflag [#allocation3], %s665_s18  ;;  %s7159_s30 = int_to_ptr.vmem [resolvable:$true] %s676_s30 }
 0x121   : > { %p6611_p8 = pneg %p7163_p4 }
 0x124   : > { %s7157_s19 = scalar_lea.hbm %s7957_s8, %s5203_s17  ;;  %s6614_s21 = scalar_lea.hbm %s7957_s8, 256 }
 0x125   : > { %s6609_s20 = scalar_lea.hbm %s7157_s19, 128  ;;  %p6615_p11 = scmp.lt.u32.totalorder %s7157_s19, %s7957_s8 }
 0x126   : > { %p6610_p10 = scmp.ne.s32.totalorder %s7157_s19, %s6609_s20  ;;  %p6616_p12 = scmp.lt.u32.totalorder %s6614_s21, %s6609_s20 }
 0x127   : > { %p6618_p0 = scmp.lt.u32.totalorder %s6609_s20, %s7157_s19 }
 0x128   : > { %p6612_p1 = pnand %p6611_p8, %p6610_p10  ;;  %p6617_p13 = por %p6616_p12, %p6615_p11 }
 0x12a   : > { %p6613_p3 = pneg %p6612_p1  ;;  %p6619_p2 = por %p6618_p0, %p6617_p13 }
 0x12c   : > { %p6620_p5 = pnand %p6619_p2, %p6613_p3 }
 0x12e   : > { %6623 = shalt.err (!%p6620_p5)
}
 0x12f   : > { %s6624_s18 = scalar_lea.vmem %s7159_s30, 128  ;;  %s6741_s25 = smov [#allocation2]  }
 0x130   : > { %p6625_p10 = scmp.ne.s32.totalorder %s7159_s30, %s6624_s18  ;;  %s6629_s6 = sshll.u32 %s6741_s25, 4  ;;  %s6630_s6 = int_to_ptr.vmem [resolvable:$false] %s6629_s6 }
 0x131   : > { %s6631_s17 = scalar_lea.vmem %s6630_s6, 256  ;;  %p6632_p7 = scmp.lt.s32.totalorder %s7159_s30, %s6630_s6 }
 0x132   : > { %p6627_p1 = pnand %p6625_p10, %p6611_p8  ;;  %p6633_p11 = scmp.lt.s32.totalorder %s6631_s17, %s6624_s18 }
 0x134   : > { %p6628_p9 = pneg %p6627_p1  ;;  %p6634_p12 = por %p6633_p11, %p6632_p7 }
 0x136   : > { %p6635_p13 = pnand %p6634_p12, %p6628_p9 }
 0x138   : > { %6638 = shalt.err (!%p6635_p13)
}
 0x139   : > { %6201 = dma.hbm_to_vmem [thread:$0]  (!%p7163_p4), %s7157_s19, 128, %s7159_s30, %s666_s5  }
 0x13a   : > { %s7959_s20 = sld [smem:[#allocation28_spill]] }
 0x140   : > { %p7960_p3 = scmp.ne.s32.totalorder %s7959_s20, 0 }
 0x142   : > { %691 = sbr.rel (%p7960_p3) target bundleno = 5268 (0x1494), region = 100 }
 0x149   : > { %s7195_s21 = sand.u32 1, %s6717_s22  }
 0x14a   : > { %s5205_s0 = sshll.u32 %s7195_s21, 3  ;;  %s694_s29 = scalar_lea.sflag [#allocation3], %s7195_s21 }
 0x14b   : > { %s697_s18 = scalar_lea.vmem [#allocation2], %s5205_s0 }
 0x14c   : > { %6684 = dma.done.wait (%p7138_p6), %s694_s29, 128  }
 0x14d   : > { %6686 = vsyncadd (%p7138_p6), %s694_s29, 4294967168  ;;  %p7961_p7 = scmp.eq.s32.totalorder %s6872_s3, 0 }
 0x14f   : > { %6688 = dma.done.wait (%p7961_p7), [#allocation6], 4096   ;;  %p7962_p9 = pmov %p7961_p7 }
 0x150   : > { %p7963_p4 = pmov %p7961_p7 }
 0x151   : > { %6690 = vsyncadd (%p7962_p9), [#allocation6], 4294963200 }
 0x152   : > { %6692 = dma.done.wait (%p7963_p4), [#allocation9], 2112   ;;  %p7964_p8 = pmov %p7963_p4 }
 0x153   : > { %p7965_p0 = pmov %p7963_p4 }
 0x154   : > { %6694 = vsyncadd (%p7964_p8), [#allocation9], 4294965184 }
 0x155   : > { %6696 = dma.done.wait (%p7965_p0), [#allocation12], 128   ;;  %p7966_p2 = pmov %p7965_p0 }
 0x156   : > { %p7967_p6 = pmov %p7965_p0 }
 0x157   : > { %6698 = vsyncadd (%p7966_p2), [#allocation12], 4294967168 }
 0x158   : > { %6700 = dma.done.wait (%p7967_p6), [#allocation15], 528   ;;  %p7968_p5 = pmov %p7965_p0 }
 0x159   : > { %p7969_p10 = pmov %p7965_p0 }
 0x15a   : > { %6702 = vsyncadd (%p7968_p5), [#allocation15], 4294966768 }
 0x15b   : > { %6704 = dma.done.wait (%p7969_p10), [#allocation18], 528   ;;  %p7970_p1 = pmov %p7965_p0 }
 0x15c   : > { %vm885_vm0 = vcmask 261120   ;;  %v7225_v0 = vld [vmem:[%s697_s18] sm:$0xff]  ;;  %v806_v7 = vld [vmem:[#allocation5] sm:$0xff]  ;;  %v807_v8 = vld [vmem:[#allocation5 + $0x8] sm:$0xff]  ;;  %v7921_v12 = vmov 0.0|0.0   ;;  %vm6743_vm1 = vmmov 0  }
 0x15d   : > { %6706 = vsyncadd (%p7970_p1), [#allocation18], 4294966768  ;;  %v886_v1 = vsel %vm885_vm0, %v7225_v0, 0.0  ;;  %v810_v9 = vld [vmem:[#allocation5 + $0x20] sm:$0xff]  ;;  %v7231_v10 = vpack.c.bf16 %v807_v8, %v806_v7  ;;  %v811_v11 = vld [vmem:[#allocation5 + $0x28] sm:$0xff]  ;;  %5943 = vmatprep.subr.bf16.mxu0 %v7921_v12  ;;  %5949 = vmatprep.subr.bf16.mxu1 %v7921_v12  ;;  %v7919_v20 = vmov 0.0  }
 0x15e   : > { %887 = vadd.xlane.f32.xlu0 %v886_v1  ;;  %v7235_v13 = vpack.c.bf16 %v811_v11, %v810_v9  ;;  %v808_v14 = vld [vmem:[#allocation5 + $0x10] sm:$0xff]  ;;  %v809_v15 = vld [vmem:[#allocation5 + $0x18] sm:$0xff]  ;;  %5507 = vmatprep.mubr.msk.f32.mxu0 %vm6743_vm1, %v7919_v20  ;;  %s7971_s30 = sld [smem:[#allocation33_spill]]  ;;  %v814_v30 = vld [vmem:[#allocation5 + $0x40] sm:$0xff]  ;;  %s7972_s25 = sld [smem:[#allocation34_spill]]  ;;  %vm1843_vm4 = vcmask 64512  }
 0x15f   : > { %5945 = vmatpush3.bf16.msra.mxu0 %v7231_v10  ;;  %v812_v16 = vld [vmem:[#allocation5 + $0x30] sm:$0xff]  ;;  %v7241_v17 = vpack.c.bf16 %v809_v15, %v808_v14  ;;  %v813_v18 = vld [vmem:[#allocation5 + $0x38] sm:$0xff]  ;;  %5518 = vmatprep.mubr.msk.f32.mxu1 %vm6743_vm1, %v7919_v20  ;;  %v815_v32 = vld [vmem:[#allocation5 + $0x48] sm:$0xff]  ;;  %p797_p11 = scmp.lt.s32.totalorder %s6872_s3, 1  ;;  %s7973_s29 = sld [smem:[#allocation32_spill]]  ;;  %vm2905_vm7 = vcmask 523264  }
 0x160   : > { %5951 = vmatpush3.bf16.msra.mxu1 %v7235_v13  ;;  %5946 = vmatprep.subr.bf16.mxu0 %v7921_v12  ;;  %v7243_v19 = vpack.c.bf16 %v813_v18, %v812_v16  ;;  %v818_v33 = vld [vmem:[#allocation5 + $0x60] sm:$0xff]  ;;  %v819_v34 = vld [vmem:[#allocation5 + $0x68] sm:$0xff]  ;;  %v7264_v38 = vpack.c.bf16 %v815_v32, %v814_v30  ;;  %v816_v40 = vld [vmem:[#allocation5 + $0x50] sm:$0xff]  ;;  %s7976_s20 = sld [smem:[#allocation36_spill]]  ;;  %s5300_s19 = sshll.u32 %s6872_s3, 7 }
 0x161   : > { %5952 = vmatprep.subr.bf16.mxu1 %v7921_v12  ;;  %v7266_v39 = vpack.c.bf16 %v819_v34, %v818_v33  ;;  %v817_v42 = vld [vmem:[#allocation5 + $0x58] sm:$0xff]  ;;  %v820_v43 = vld [vmem:[#allocation5 + $0x70] sm:$0xff]  ;;  %v822_v47 = vld [vmem:[#allocation7] sm:$0xff]  ;;  %s798_s6 = scalar_select %p797_p11, %s6872_s3, 1 }
 0x162   : > { %v821_v44 = vld [vmem:[#allocation5 + $0x78] sm:$0xff]  ;;  %v7277_v45 = vpack.c.bf16 %v817_v42, %v816_v40  ;;  %v823_v48 = vld [vmem:[#allocation7 + $0x8] sm:$0xff]  ;;  %v826_v49 = vld [vmem:[#allocation7 + $0x20] sm:$0xff]  ;;  %s7985_s26 = sld [smem:[#allocation44_spill]]  ;;  %s796_s27 = scalar_lea.vmem [#allocation20], %s5205_s0 }
 0x163   : > { %5948 = vmatpush3.bf16.msra.mxu0 %v7241_v17  ;;  %v7279_v46 = vpack.c.bf16 %v821_v44, %v820_v43  ;;  %v827_v50 = vld [vmem:[#allocation7 + $0x28] sm:$0xff]  ;;  %v7289_v51 = vpack.c.bf16 %v823_v48, %v822_v47  ;;  %v824_v53 = vld [vmem:[#allocation7 + $0x10] sm:$0xff]  ;;  %v825_v54 = vld [vmem:[#allocation7 + $0x18] sm:$0xff]  ;;  %s5015_s5 = sshll.u32 %s796_s27, 4  ;;  %s7986_s8 = sld [smem:[#allocation45_spill]]  ;;  %s7842_s5 = int_to_ptr.vmem [resolvable:$true] %s5015_s5 }
 0x164   : > { %5954 = vmatpush3.bf16.msra.mxu1 %v7243_v19  ;;  %5955 = vmatprep.subr.bf16.mxu0 %v7921_v12  ;;  %v7256_v29 = vld [vmem:[%s7971_s30] ss:$0 sm:$0xff]  ;;  %v7291_v52 = vpack.c.bf16 %v827_v50, %v826_v49  ;;  %v829_v56 = vld [vmem:[#allocation7 + $0x38] sm:$0xff]  ;;  %v7301_v57 = vpack.c.bf16 %v825_v54, %v824_v53  ;;  %v830_v59 = vld [vmem:[#allocation7 + $0x40] sm:$0xff]  ;;  %s7974_s30 = sld [smem:[#allocation41_spill]]  ;;  %s6639_s17 = scalar_lea.vmem %s7842_s5, 128 }
 0x165   : > { %5961 = vmatprep.subr.bf16.mxu1 %v7921_v12  ;;  %v7262_v36 = vld [vmem:[%s7972_s25] ss:$0 sm:$0xff]  ;;  %v831_v60 = vld [vmem:[#allocation7 + $0x48] sm:$0xff]  ;;  %v834_v61 = vld [vmem:[#allocation7 + $0x60] sm:$0xff]  ;;  %s799_s18 = scalar_lea.vmem %s7973_s29, %s798_s6  ;;  %s7975_s25 = sld [smem:[#allocation35_spill]] }
 0x166   : > { %v828_v55 = vld [vmem:[#allocation7 + $0x30] sm:$0xff]  ;;  %v835_v62 = vld [vmem:[#allocation7 + $0x68] sm:$0xff]  ;;  %v7313_v63 = vpack.c.bf16 %v831_v60, %v830_v59  ;;  %v838_v8 = vld [vmem:[#allocation8] sm:$0xff]  ;;  %s5002_s6 = scalar_lea.sflag [#allocation4], %s7195_s21  ;;  %p6640_p12 = scmp.ne.s32.totalorder %s7842_s5, %s6639_s17 }
 0x167   : > { %v7303_v58 = vpack.c.bf16 %v829_v56, %v828_v55  ;;  %v7315_v1 = vpack.c.bf16 %v835_v62, %v834_v61  ;;  %v839_v9 = vld [vmem:[#allocation8 + $0x8] sm:$0xff]  ;;  %v842_v11 = vld [vmem:[#allocation8 + $0x20] sm:$0xff]  ;;  %v840_v18 = vld [vmem:[#allocation8 + $0x10] sm:$0xff]  ;;  %p7987_p13 = scmp.ne.s32.totalorder %s7955_s16, 0  ;;  %s6745_s3 = smov [#allocation20]  }
 0x168   : > { %v843_v14 = vld [vmem:[#allocation8 + $0x28] sm:$0xff]  ;;  %v7337_v15 = vpack.c.bf16 %v839_v9, %v838_v8  ;;  %v848_v33 = vld [vmem:[#allocation8 + $0x50] sm:$0xff]  ;;  %v849_v34 = vld [vmem:[#allocation8 + $0x58] sm:$0xff]  ;;  %s6643_s0 = sshll.u32 %s6745_s3, 4  ;;  %s6644_s0 = int_to_ptr.vmem [resolvable:$false] %s6643_s0 }
 0x169   : > { %v7339_v16 = vpack.c.bf16 %v843_v14, %v842_v11  ;;  %v851_v30 = vld [vmem:[#allocation8 + $0x68] sm:$0xff]  ;;  %v7373_v40 = vpack.c.bf16 %v849_v34, %v848_v33  ;;  %v7395_v55 = vld [vmem:[#allocation11] ss:$0 sm:$0xff]  ;;  %v7409_v8 = vld [vmem:[#allocation11 + $0x2] ss:$0 sm:$0xff]  ;;  %s7840_s9 = scalar_lea.hbm %s7986_s8, %s5300_s19  ;;  %p6641_p3 = pnand %p6640_p12, %p7987_p13 }
 0x16a   : > { %v7411_v9 = vld [vmem:[#allocation11 + $0x3] ss:$0 sm:$0xff]  ;;  %v7435_v34 = vld [vmem:[#allocation13] ss:$0 sm:$0xff]  ;;  %p6646_p9 = scmp.lt.s32.totalorder %s7842_s5, %s6644_s0 }
 0x16b   : > { %p6642_p7 = pneg %p6641_p3 }
 0x1eb   : > { %v888_v2 = vpop.xlane.xlu0 %887 }
 0x1ec   : > { %v890_v3 = vmul.f32 0.03125, %v888_v2  ;;  %v832_v2 = vld [vmem:[#allocation7 + $0x50] sm:$0xff] }
 0x1ee   : > { %v891_v4 = vsub.f32 %v7225_v0, %v890_v3  ;;  %v833_v3 = vld [vmem:[#allocation7 + $0x58] sm:$0xff] }
 0x1f0   : > { %v892_v5 = vmul.f32 %v891_v4, %v891_v4  ;;  %v911_v31 = vmul.f32 %v7256_v29, %v891_v4  ;;  %v836_v4 = vld [vmem:[#allocation7 + $0x70] sm:$0xff] }
 0x1f2   : > { %v893_v6 = vsel %vm885_vm0, %v892_v5, 0.0  ;;  %v837_v5 = vld [vmem:[#allocation7 + $0x78] sm:$0xff] }
 0x1f3   : > { %894 = vadd.xlane.f32.xlu0 %v893_v6  ;;  %v7325_v6 = vpack.c.bf16 %v833_v3, %v832_v2  ;;  %v7327_v7 = vpack.c.bf16 %v837_v5, %v836_v4  ;;  %v7400_v2 = vld [vmem:[#allocation11 + $0x1] ss:$0 sm:$0xff]  ;;  %v7405_v4 = vld [vmem:[#allocation10 + $0x1] ss:$0 sm:$0xff] }
 0x280   : > { %v895_v21 = vpop.xlane.xlu0 %894 }
 0x281   : > { %v897_v22 = vmul.f32 0.032258064, %v895_v21  ;;  %v841_v21 = vld [vmem:[#allocation8 + $0x18] sm:$0xff] }
 0x283   : > { %6277 = vrsqrt.f32 %v897_v22  ;;  %vm900_vm2 = vcmp.eq.f32.partialorder %v897_v22, inf  ;;  %v903_v25 = vand.u32 2147483648, %v897_v22  ;;  %vm902_vm3 = vcmp.eq.f32.partialorder %v897_v22, 0.0 }
 0x28d   : > { %v6278_v23 = vpop.eup %6277 }
 0x28e   : > { %v899_v24 = vmul.f32 %v6278_v23, %v897_v22  ;;  %v845_v23 = vld [vmem:[#allocation8 + $0x38] sm:$0xff] }
 0x290   : > { %v901_v26 = vsel %vm900_vm2, %v897_v22, %v899_v24  ;;  %v844_v22 = vld [vmem:[#allocation8 + $0x30] sm:$0xff]  ;;  %v7349_v24 = vpack.c.bf16 %v841_v21, %v840_v18  ;;  %v7418_v21 = vld [vmem:[#allocation10 + $0x2] ss:$0 sm:$0xff] }
 0x291   : > { %v904_v27 = vsel %vm902_vm3, %v903_v25, %v901_v26  ;;  %v7351_v25 = vpack.c.bf16 %v845_v23, %v844_v22  ;;  %v846_v26 = vld [vmem:[#allocation8 + $0x40] sm:$0xff] }
 0x292   : > { %v912_v28 = vadd.f32 1e-06, %v904_v27  ;;  %v847_v27 = vld [vmem:[#allocation8 + $0x48] sm:$0xff]  ;;  %v7420_v22 = vld [vmem:[#allocation10 + $0x3] ss:$0 sm:$0xff] }
 0x294   : > { %6279 = vrcp.f32 %v912_v28  ;;  %v850_v28 = vld [vmem:[#allocation8 + $0x60] sm:$0xff] }
 0x295   : > { %v7363_v32 = vpack.c.bf16 %v851_v30, %v850_v28 }
 0x29e   : > { %v6280_v35 = vpop.eup %6279 }
 0x29f   : > { %v914_v37 = vmul.f32 %v6280_v35, %v911_v31  ;;  %v7361_v31 = vpack.c.bf16 %v847_v27, %v846_v26  ;;  %v852_v35 = vld [vmem:[#allocation8 + $0x70] sm:$0xff] }
 0x2a1   : > { %v7269_v41 = vadd.f32 %v7262_v36, %v914_v37  ;;  %v853_v37 = vld [vmem:[#allocation8 + $0x78] sm:$0xff] }
 0x2a2   : > { %v7375_v42 = vpack.c.bf16 %v853_v37, %v852_v35  ;;  %v7437_v35 = vld [vmem:[#allocation13 + $0x1] ss:$0 sm:$0xff] }
 0x2a3   : > { %5508 = vmatmul.mubr.msk.f32.vlgmr.msra.gmra.mrb[0].mxu0 %vm885_vm0, %v7269_v41  ;;  %5519 = vmatmul.mubr.msk.f32.vlgmr.msra.gmra.mrb[0].mxu1 %vm885_vm0, %v7269_v41 }
 0x2a4   : > { %5957 = vmatpush3.bf16.msra.mxu0 %v7264_v38  ;;  %5963 = vmatpush3.bf16.msra.mxu1 %v7266_v39 }
 0x2a5   : > { %5958 = vmatprep.subr.bf16.mxu0 %v7921_v12  ;;  %5964 = vmatprep.subr.bf16.mxu1 %v7921_v12 }
 0x2a6   : > { %5529 = vmatprep.mubr.msk.f32.mxu0 %vm6743_vm1, %v7919_v20  ;;  %5540 = vmatprep.mubr.msk.f32.mxu1 %vm6743_vm1, %v7919_v20 }
 0x2a8   : > { %5960 = vmatpush3.bf16.msra.mxu0 %v7277_v45  ;;  %5966 = vmatpush3.bf16.msra.mxu1 %v7279_v46 }
 0x2a9   : > { %5967 = vmatprep.subr.bf16.mxu0 %v7921_v12  ;;  %5973 = vmatprep.subr.bf16.mxu1 %v7921_v12 }
 0x2ab   : > { %5530 = vmatmul.mubr.msk.f32.vlgmr.msra.gmra.mrb[2].mxu0 %vm885_vm0, %v7269_v41  ;;  %5541 = vmatmul.mubr.msk.f32.vlgmr.msra.gmra.mrb[2].mxu1 %vm885_vm0, %v7269_v41 }
 0x2ac   : > { %5969 = vmatpush3.bf16.msra.mxu0 %v7289_v51  ;;  %5975 = vmatpush3.bf16.msra.mxu1 %v7291_v52 }
 0x2ad   : > { %5970 = vmatprep.subr.bf16.mxu0 %v7921_v12  ;;  %5976 = vmatprep.subr.bf16.mxu1 %v7921_v12 }
 0x2ae   : > { %5551 = vmatprep.mubr.msk.f32.mxu0 %vm6743_vm1, %v7919_v20  ;;  %5562 = vmatprep.mubr.msk.f32.mxu1 %vm6743_vm1, %v7919_v20 }
 0x2b0   : > { %5972 = vmatpush3.bf16.msra.mxu0 %v7301_v57  ;;  %5978 = vmatpush3.bf16.msra.mxu1 %v7303_v58 }
 0x2b1   : > { %5979 = vmatprep.subr.bf16.mxu0 %v7921_v12  ;;  %5985 = vmatprep.subr.bf16.mxu1 %v7921_v12 }
 0x2b3   : > { %5552 = vmatmul.mubr.msk.f32.vlgmr.msra.gmra.mrb[4].mxu0 %vm885_vm0, %v7269_v41  ;;  %5563 = vmatmul.mubr.msk.f32.vlgmr.msra.gmra.mrb[4].mxu1 %vm885_vm0, %v7269_v41 }
 0x2b4   : > { %5981 = vmatpush3.bf16.msra.mxu0 %v7313_v63  ;;  %5987 = vmatpush3.bf16.msra.mxu1 %v7315_v1 }
 0x2b5   : > { %5982 = vmatprep.subr.bf16.mxu0 %v7921_v12  ;;  %5988 = vmatprep.subr.bf16.mxu1 %v7921_v12 }
 0x2b6   : > { %5573 = vmatprep.mubr.msk.f32.mxu0 %vm6743_vm1, %v7919_v20  ;;  %5584 = vmatprep.mubr.msk.f32.mxu1 %vm6743_vm1, %v7919_v20 }
 0x2b8   : > { %5984 = vmatpush3.bf16.msra.mxu0 %v7325_v6  ;;  %5990 = vmatpush3.bf16.msra.mxu1 %v7327_v7 }
 0x2b9   : > { %5991 = vmatprep.subr.bf16.mxu0 %v7921_v12  ;;  %5997 = vmatprep.subr.bf16.mxu1 %v7921_v12 }
 0x2bb   : > { %5574 = vmatmul.mubr.msk.f32.vlgmr.msra.gmra.mrb[6].mxu0 %vm885_vm0, %v7269_v41  ;;  %5585 = vmatmul.mubr.msk.f32.vlgmr.msra.gmra.mrb[6].mxu1 %vm885_vm0, %v7269_v41 }
 0x2bc   : > { %5993 = vmatpush3.bf16.msra.mxu0 %v7337_v15  ;;  %5999 = vmatpush3.bf16.msra.mxu1 %v7339_v16 }
 0x2bd   : > { %5994 = vmatprep.subr.bf16.mxu0 %v7921_v12  ;;  %6000 = vmatprep.subr.bf16.mxu1 %v7921_v12 }
 0x2be   : > { %5595 = vmatprep.mubr.msk.f32.mxu0 %vm6743_vm1, %v7919_v20  ;;  %5606 = vmatprep.mubr.msk.f32.mxu1 %vm6743_vm1, %v7919_v20 }
 0x2c0   : > { %5996 = vmatpush3.bf16.msra.mxu0 %v7349_v24  ;;  %6002 = vmatpush3.bf16.msra.mxu1 %v7351_v25 }
 0x2c1   : > { %6003 = vmatprep.subr.bf16.mxu0 %v7921_v12  ;;  %6009 = vmatprep.subr.bf16.mxu1 %v7921_v12 }
 0x2c3   : > { %5596 = vmatmul.mubr.msk.f32.vlgmr.msra.gmra.mrb[8].mxu0 %vm885_vm0, %v7269_v41  ;;  %5607 = vmatmul.mubr.msk.f32.vlgmr.msra.gmra.mrb[8].mxu1 %vm885_vm0, %v7269_v41 }
 0x2c4   : > { %6005 = vmatpush3.bf16.msra.mxu0 %v7361_v31  ;;  %6011 = vmatpush3.bf16.msra.mxu1 %v7363_v32 }
 0x2c5   : > { %6006 = vmatprep.subr.bf16.mxu0 %v7921_v12  ;;  %6012 = vmatprep.subr.bf16.mxu1 %v7921_v12 }
 0x2c6   : > { %5617 = vmatprep.mubr.msk.f32.mxu0 %vm6743_vm1, %v7919_v20  ;;  %5628 = vmatprep.mubr.msk.f32.mxu1 %vm6743_vm1, %v7919_v20 }
 0x2c8   : > { %6008 = vmatpush3.bf16.msra.mxu0 %v7373_v40  ;;  %6014 = vmatpush3.bf16.msra.mxu1 %v7375_v42 }
 0x2c9   : > { %5631 = vmatprep.subr.mxu0 %v7919_v20  ;;  %5646 = vmatprep.subr.mxu1 %v7919_v20 }
 0x2cb   : > { %5618 = vmatmul.mubr.msk.f32.vlgmr.msra.gmra.mrb[10].mxu0 %vm885_vm0, %v7269_v41  ;;  %5629 = vmatmul.mubr.msk.f32.vlgmr.msra.gmra.mrb[10].mxu1 %vm885_vm0, %v7269_v41  ;;  %v7397_v41 = vld [vmem:[#allocation10] ss:$0 sm:$0xff] }
 0x2cc   : > { %5633 = vmatprep.mubr.msk.f32.mxu0 %vm6743_vm1, %v7919_v20  ;;  %5648 = vmatprep.mubr.msk.f32.mxu1 %vm6743_vm1, %v7919_v20 }
 0x376   : > { %v1015_v43 = vpop.f32.mrb[0].mxu0  ;;  %v1085_v44 = vpop.f32.mrb[0].mxu1 }
 0x377   : > { %v5509_v47 = vpop.f32.mrb[1].mxu0  ;;  %v5520_v48 = vpop.f32.mrb[1].mxu1  ;;  %v1016_v3 = vadd.f32 %v7397_v41, %v1015_v43  ;;  %v1086_v11 = vadd.f32 %v7405_v4, %v1085_v44 }
 0x37e   : > { %v1155_v49 = vpop.f32.mrb[2].mxu0  ;;  %v1225_v50 = vpop.f32.mrb[2].mxu1 }
 0x37f   : > { %v5531_v53 = vpop.f32.mrb[3].mxu0  ;;  %v5542_v54 = vpop.f32.mrb[3].mxu1  ;;  %v1156_v30 = vadd.f32 %v7418_v21, %v1155_v49  ;;  %v1226_v33 = vadd.f32 %v7420_v22, %v1225_v50 }
 0x386   : > { %v1319_v56 = vpop.f32.mrb[4].mxu0  ;;  %v1389_v59 = vpop.f32.mrb[4].mxu1 }
 0x387   : > { %v1320_v60 = vadd.f32 %v7395_v55, %v1319_v56  ;;  %v5553_v61 = vpop.f32.mrb[5].mxu0  ;;  %v5564_v62 = vpop.f32.mrb[5].mxu1  ;;  %v1390_v5 = vadd.f32 %v7400_v2, %v1389_v59  ;;  %v7456_v59 = vld [vmem:[%s799_s18] ss:$0 sm:$0xff] }
 0x389   : > { %5632 = vmatpush3.xpose.msk.msra.mxu0 %vm1843_vm4, %v1320_v60 }
 0x38a   : > { %5636 = vmatprep.subr.mxu0 %v7919_v20 }
 0x38c   : > { %5634 = vmatmul.mubr.msk.f32.vlgmr.msra.gmra.mrb[12].mxu0 %vm1843_vm4, %v1016_v3 }
 0x38d   : > { %5637 = vmatpush3.xpose.msk.msra.mxu0 %vm1843_vm4, %v1390_v5  ;;  %5638 = vmatprep.mubr.msk.f32.mxu0 %vm6743_vm1, %v7919_v20 }
 0x38e   : > { %v1459_v14 = vpop.f32.mrb[6].mxu0  ;;  %v1529_v18 = vpop.f32.mrb[6].mxu1  ;;  %5641 = vmatprep.subr.mxu0 %v7919_v20 }
 0x38f   : > { %v1460_v23 = vadd.f32 %v7409_v8, %v1459_v14  ;;  %v1530_v26 = vadd.f32 %v7411_v9, %v1529_v18  ;;  %v5575_v27 = vpop.f32.mrb[7].mxu0  ;;  %v5586_v28 = vpop.f32.mrb[7].mxu1 }
 0x390   : > { %5639 = vmatmul.mubr.msk.f32.vlgmr.msra.gmra.mrb[14].mxu0 %vm1843_vm4, %v1086_v11 }
 0x391   : > { %5642 = vmatpush3.xpose.msk.msra.mxu0 %vm1843_vm4, %v1460_v23  ;;  %5647 = vmatpush3.xpose.msk.msra.mxu1 %vm1843_vm4, %v1530_v26 }
 0x392   : > { %5643 = vmatprep.mubr.msk.f32.mxu0 %vm6743_vm1, %v7919_v20  ;;  %5651 = vmatprep.subr.mxu0 %v7919_v20 }
 0x393   : > { %5656 = vmatprep.subr.mxu1 %v7919_v20 }
 0x394   : > { %5644 = vmatmul.mubr.msk.f32.vlgmr.msra.gmra.mrb[16].mxu0 %vm1843_vm4, %v1156_v30  ;;  %5649 = vmatmul.mubr.msk.f32.vlgmr.msra.gmra.mrb[12].mxu1 %vm1843_vm4, %v1226_v33 }
 0x395   : > { %5653 = vmatprep.mubr.msk.f32.mxu0 %vm6743_vm1, %v7919_v20  ;;  %5658 = vmatprep.mubr.msk.f32.mxu1 %vm6743_vm1, %v7919_v20 }
 0x396   : > { %v1623_v37 = vpop.f32.mrb[8].mxu0  ;;  %v1693_v43 = vpop.f32.mrb[8].mxu1 }
 0x397   : > { %v1624_v44 = vadd.f32 %v7435_v34, %v1623_v37  ;;  %v1694_v47 = vadd.f32 %v7437_v35, %v1693_v43  ;;  %v5597_v48 = vpop.f32.mrb[9].mxu0  ;;  %v5608_v49 = vpop.f32.mrb[9].mxu1 }
 0x399   : > { %5652 = vmatpush3.msra.mxu0 %v1624_v44  ;;  %5657 = vmatpush3.msra.mxu1 %v1694_v47 }
 0x39a   : > { %5661 = vmatprep.subr.mxu0 %v7919_v20  ;;  %5666 = vmatprep.subr.mxu1 %v7919_v20 }
 0x39e   : > { %v7447_v50 = vpop.f32.mrb[10].mxu0  ;;  %v7449_v53 = vpop.f32.mrb[10].mxu1 }
 0x39f   : > { %v5619_v54 = vpop.f32.mrb[11].mxu0  ;;  %v5630_v56 = vpop.f32.mrb[11].mxu1 }
 0x45f   : > { %v1916_v60 = vpop.f32.mrb[12].mxu0 }
 0x460   : > { %v1917_v61 = vadd.f32 %v7456_v59, %v1916_v60  ;;  %v5635_v62 = vpop.f32.mrb[13].mxu0 }
 0x462   : > { %v2148_v3 = vsel %vm1843_vm4, %v1917_v61, -inf }
 0x463   : > { %2149 = vmax.xlane.f32.xlu1 %v2148_v3  ;;  %v1992_v5 = vpop.f32.mrb[14].mxu0 }
 0x464   : > { %v1993_v11 = vadd.f32 %v7456_v59, %v1992_v5  ;;  %v5640_v14 = vpop.f32.mrb[15].mxu0 }
 0x466   : > { %v2151_v18 = vsel %vm1843_vm4, %v1993_v11, -inf }
 0x467   : > { %v2144_v23 = vpop.f32.mrb[12].mxu1  ;;  %2152 = vmax.xlane.f32.xlu1 %v2151_v18  ;;  %v2068_v26 = vpop.f32.mrb[16].mxu0 }
 0x468   : > { %v2145_v27 = vadd.f32 %v7456_v59, %v2144_v23  ;;  %v2069_v28 = vadd.f32 %v7456_v59, %v2068_v26  ;;  %v5645_v30 = vpop.f32.mrb[17].mxu0  ;;  %v5650_v33 = vpop.f32.mrb[13].mxu1 }
 0x46a   : > { %v2157_v37 = vsel %vm1843_vm4, %v2145_v27, -inf  ;;  %v2154_v43 = vsel %vm1843_vm4, %v2069_v28, -inf }
 0x46b   : > { %2158 = vmax.xlane.f32.xlu1 %v2157_v37  ;;  %2155 = vmax.xlane.f32.xlu0 %v2154_v43 }
 0x4f0   : > { %v2150_v44 = vpop.xlane.xlu1 %2149 }
 0x4f1   : > { %v2160_v47 = vsub.f32 %v1917_v61, %v2150_v44 }
 0x4f3   : > { %v2164_v48 = vmul.f32 1.442695, %v2160_v47 }
 0x4f4   : > { %v2153_v49 = vpop.xlane.xlu1 %2152 }
 0x4f5   : > { %6281 = vpow2.f32 %v2164_v48  ;;  %v2161_v54 = vsub.f32 %v1993_v11, %v2153_v49  ;;  %v7470_v48 = vld [vmem:[#allocation13 + $0x2] ss:$0 sm:$0xff] }
 0x4f7   : > { %v2166_v56 = vmul.f32 1.442695, %v2161_v54 }
 0x4f8   : > { %v2159_v60 = vpop.xlane.xlu1 %2158  ;;  %v2156_v62 = vpop.xlane.xlu0 %2155 }
 0x4f9   : > { %6283 = vpow2.f32 %v2166_v56  ;;  %v2163_v3 = vsub.f32 %v2145_v27, %v2159_v60  ;;  %v2162_v5 = vsub.f32 %v2069_v28, %v2156_v62  ;;  %v1764_v56 = vadd.f32 %v7470_v48, %v7447_v50  ;;  %v7474_v60 = vld [vmem:[#allocation13 + $0x3] ss:$0 sm:$0xff] }
 0x4fb   : > { %v2170_v14 = vmul.f32 1.442695, %v2163_v3  ;;  %v2168_v18 = vmul.f32 1.442695, %v2162_v5  ;;  %v1834_v5 = vadd.f32 %v7474_v60, %v7449_v53  ;;  %v7492_v53 = vld [vmem:[#allocation14] sm:$0xff] }
 0x4fd   : > { %6285 = vpow2.f32 %v2170_v14 }
 0x4fe   : > { %6287 = vpow2.f32 %v2168_v18 }
 0x4ff   : > { %v6282_v23 = vpop.eup %6281 }
 0x500   : > { %v2172_v26 = vsel %vm1843_vm4, %v6282_v23, 0.0 }
 0x501   : > { %2173 = vadd.xlane.f32.xlu0 %v2172_v26  ;;  %v7496_v26 = vld [vmem:[#allocation14 + $0x8] sm:$0xff] }
 0x503   : > { %v6284_v30 = vpop.eup %6283 }
 0x504   : > { %v2175_v61 = vsel %vm1843_vm4, %v6284_v30, 0.0 }
 0x505   : > { %2176 = vadd.xlane.f32.xlu1 %v2175_v61 }
 0x507   : > { %v6286_v33 = vpop.eup %6285 }
 0x508   : > { %v6288_v11 = vpop.eup %6287  ;;  %v2181_v37 = vsel %vm1843_vm4, %v6286_v33, 0.0 }
 0x509   : > { %2182 = vadd.xlane.f32.xlu1 %v2181_v37  ;;  %v2178_v27 = vsel %vm1843_vm4, %v6288_v11, 0.0 }
 0x50a   : > { %2179 = vadd.xlane.f32.xlu0 %v2178_v27 }
 0x58e   : > { %v2174_v28 = vpop.xlane.xlu0 %2173 }
 0x58f   : > { %6289 = vrcp.f32 %v2174_v28 }
 0x592   : > { %v2177_v43 = vpop.xlane.xlu1 %2176 }
 0x593   : > { %6291 = vrcp.f32 %v2177_v43 }
 0x596   : > { %v2183_v44 = vpop.xlane.xlu1 %2182 }
 0x597   : > { %6293 = vrcp.f32 %v2183_v44  ;;  %v2180_v47 = vpop.xlane.xlu0 %2179 }
 0x598   : > { %6295 = vrcp.f32 %v2180_v47 }
 0x599   : > { %v6290_v49 = vpop.eup %6289 }
 0x59a   : > { %v2188_v54 = vmul.f32 %v6290_v49, %v6282_v23 }
 0x59c   : > { %5654 = vmatmul.mubr.msk.f32.vlgmr.msra.gmra.mrb[18].mxu0 %vm1843_vm4, %v2188_v54 }
 0x59d   : > { %v6292_v62 = vpop.eup %6291  ;;  %5662 = vmatpush3.msra.mxu0 %v1764_v56  ;;  %5663 = vmatprep.mubr.msk.f32.mxu0 %vm6743_vm1, %v7919_v20 }
 0x59e   : > { %v2189_v3 = vmul.f32 %v6292_v62, %v6284_v30  ;;  %5671 = vmatprep.subr.mxu0 %v7919_v20  ;;  %v7500_v30 = vld [vmem:[#allocation14 + $0x10] sm:$0xff] }
 0x5a0   : > { %5659 = vmatmul.mubr.msk.f32.vlgmr.msra.gmra.mrb[14].mxu1 %vm1843_vm4, %v2189_v3 }
 0x5a1   : > { %v6294_v14 = vpop.eup %6293  ;;  %5667 = vmatpush3.msra.mxu1 %v1834_v5  ;;  %5668 = vmatprep.mubr.msk.f32.mxu1 %vm6743_vm1, %v7919_v20 }
 0x5a2   : > { %v6296_v50 = vpop.eup %6295  ;;  %v2191_v18 = vmul.f32 %v6294_v14, %v6286_v33  ;;  %5676 = vmatprep.subr.mxu1 %v7919_v20 }
 0x5a3   : > { %v2190_v23 = vmul.f32 %v6296_v50, %v6288_v11  ;;  %v7506_v11 = vld [vmem:[#allocation14 + $0x18] sm:$0xff] }
 0x5a4   : > { %5669 = vmatmul.mubr.msk.f32.vlgmr.msra.gmra.mrb[16].mxu1 %vm1843_vm4, %v2191_v18 }
 0x5a5   : > { %5664 = vmatmul.mubr.msk.f32.vlgmr.msra.gmra.mrb[20].mxu0 %vm1843_vm4, %v2190_v23  ;;  %5678 = vmatprep.mubr.msk.f32.mxu1 %vm6743_vm1, %v7919_v20 }
 0x5a6   : > { %5673 = vmatprep.mubr.msk.f32.mxu0 %vm6743_vm1, %v7919_v20  ;;  %5672 = vmatpush3.msra.mxu0 %v7492_v53 }
 0x5a7   : > { %5681 = vmatprep.subr.mxu0 %v7919_v20  ;;  %5677 = vmatpush3.msra.mxu1 %v7496_v26 }
 0x5a8   : > { %5686 = vmatprep.subr.mxu1 %v7919_v20 }
 0x66f   : > { %v2261_v61 = vpop.f32.mrb[18].mxu0 }
 0x670   : > { %v5655_v33 = vpop.f32.mrb[19].mxu0  ;;  %5674 = vmatmul.mubr.msk.f32.vlgmr.msra.gmra.mrb[22].mxu0 %vm1843_vm4, %v2261_v61 }
 0x671   : > { %5682 = vmatpush3.msra.mxu0 %v7500_v30  ;;  %5683 = vmatprep.mubr.msk.f32.mxu0 %vm6743_vm1, %v7919_v20 }
 0x672   : > { %6015 = vmatprep.subr.bf16.mxu0 %v7921_v12 }
 0x673   : > { %v2334_v37 = vpop.f32.mrb[14].mxu1 }
 0x674   : > { %v5660_v27 = vpop.f32.mrb[15].mxu1  ;;  %5679 = vmatmul.mubr.msk.f32.vlgmr.msra.gmra.mrb[18].mxu1 %vm1843_vm4, %v2334_v37 }
 0x675   : > { %5687 = vmatpush3.msra.mxu1 %v7506_v11  ;;  %5688 = vmatprep.mubr.msk.f32.mxu1 %vm6743_vm1, %v7919_v20  ;;  %v7523_v27 = vld [vmem:[#allocation16] ss:$0 sm:$0xff] }
 0x676   : > { %6021 = vmatprep.subr.bf16.mxu1 %v7921_v12 }
 0x677   : > { %v2480_v28 = vpop.f32.mrb[16].mxu1 }
 0x678   : > { %v2407_v43 = vpop.f32.mrb[20].mxu0  ;;  %v5670_v44 = vpop.f32.mrb[17].mxu1  ;;  %5689 = vmatmul.mubr.msk.f32.vlgmr.msra.gmra.mrb[20].mxu1 %vm1843_vm4, %v2480_v28 }
 0x679   : > { %v5665_v47 = vpop.f32.mrb[21].mxu0  ;;  %5684 = vmatmul.mubr.msk.f32.vlgmr.msra.gmra.mrb[24].mxu0 %vm1843_vm4, %v2407_v43  ;;  %5718 = vmatprep.mubr.msk.f32.mxu1 %vm6743_vm1, %v7919_v20 }
 0x67a   : > { %5699 = vmatprep.mubr.msk.f32.mxu0 %vm6743_vm1, %v7919_v20 }
 0x743   : > { %v2553_v49 = vpop.f32.mrb[22].mxu0 }
 0x744   : > { %v5675_v54 = vpop.f32.mrb[23].mxu0  ;;  %v2776_v62 = vsel %vm885_vm0, %v2553_v49, 0.0 }
 0x747   : > { %v2626_v56 = vpop.f32.mrb[18].mxu1 }
 0x748   : > { %v2777_v3 = vsel %vm885_vm0, %v2626_v56, 0.0  ;;  %v5680_v5 = vpop.f32.mrb[19].mxu1 }
 0x749   : > { %v2778_v14 = vadd.f32 %v2777_v3, %v2776_v62 }
 0x74b   : > { %v2772_v50 = vpop.f32.mrb[20].mxu1 }
 0x74c   : > { %v2699_v18 = vpop.f32.mrb[24].mxu0  ;;  %v5690_v23 = vpop.f32.mrb[21].mxu1  ;;  %v2781_v28 = vsel %vm885_vm0, %v2772_v50, 0.0  ;;  %v872_v50 = vld [vmem:[#allocation17 + $0x8] sm:$0xff] }
 0x74d   : > { %v2779_v61 = vsel %vm885_vm0, %v2699_v18, 0.0  ;;  %v5685_v33 = vpop.f32.mrb[25].mxu0  ;;  %v873_v18 = vld [vmem:[#allocation17 + $0x10] sm:$0xff] }
 0x74e   : > { %v2780_v37 = vadd.f32 %v2779_v61, %v2778_v14  ;;  %v871_v14 = vld [vmem:[#allocation17] sm:$0xff]  ;;  %v874_v61 = vld [vmem:[#allocation17 + $0x18] sm:$0xff] }
 0x74f   : > { %v7534_v23 = vpack.c.bf16 %v872_v50, %v871_v14  ;;  %v876_v33 = vld [vmem:[%s7974_s30] sm:$0xff] }
 0x750   : > { %v2782_v43 = vadd.f32 %v2781_v28, %v2780_v37  ;;  %v877_v37 = vld [vmem:[%s7974_s30 + $0x8] sm:$0xff]  ;;  %v878_v28 = vld [vmem:[%s7974_s30 + $0x10] sm:$0xff] }
 0x751   : > { %6017 = vmatpush3.bf16.msra.mxu0 %v7534_v23 }
 0x752   : > { %v2789_v44 = vadd.f32 %v7523_v27, %v2782_v43  ;;  %6018 = vmatprep.subr.bf16.mxu0 %v7921_v12  ;;  %v7551_v43 = vpack.c.bf16 %v877_v37, %v876_v33 }
 0x754   : > { %v7528_v47 = vadd.f32 %v2789_v44, %v7225_v0  ;;  %v7537_v0 = vpack.c.bf16 %v874_v61, %v873_v18  ;;  %v879_v44 = vld [vmem:[%s7974_s30 + $0x18] sm:$0xff]  ;;  %6023 = vmatpush3.bf16.msra.mxu1 %v7551_v43 }
 0x755   : > { %6024 = vmatprep.subr.bf16.mxu1 %v7921_v12 }
 0x756   : > { %v2791_v49 = vsel %vm885_vm0, %v7528_v47, 0.0  ;;  %6020 = vmatpush3.bf16.msra.mxu0 %v7537_v0 }
 0x757   : > { %2792 = vadd.xlane.f32.xlu0 %v2791_v49  ;;  %6033 = vmatprep.subr.bf16.mxu0 %v7921_v12  ;;  %v7557_v49 = vpack.c.bf16 %v879_v44, %v878_v28  ;;  %v7575_v44 = vld [vmem:[%s7975_s25] ss:$0 sm:$0xff]  ;;  %s7978_s25 = sld [smem:[#allocation42_spill]] }
 0x759   : > { %6026 = vmatpush3.bf16.msra.mxu1 %v7557_v49 }
 0x75a   : > { %6027 = vmatprep.subr.bf16.mxu1 %v7921_v12 }
 0x7e4   : > { %v2793_v54 = vpop.xlane.xlu0 %2792 }
 0x7e5   : > { %v2794_v56 = vmul.f32 0.03125, %v2793_v54  ;;  %v880_v54 = vld [vmem:[%s7974_s30 + $0x20] sm:$0xff] }
 0x7e7   : > { %v2795_v62 = vsub.f32 %v7528_v47, %v2794_v56  ;;  %v881_v56 = vld [vmem:[%s7974_s30 + $0x28] sm:$0xff] }
 0x7e9   : > { %v2796_v3 = vmul.f32 %v2795_v62, %v2795_v62 }
 0x7eb   : > { %v2797_v5 = vsel %vm885_vm0, %v2796_v3, 0.0  ;;  %v7567_v3 = vpack.c.bf16 %v881_v56, %v880_v54  ;;  %v2814_v54 = vmul.f32 %v7575_v44, %v2795_v62  ;;  %v882_v62 = vld [vmem:[%s7974_s30 + $0x30] sm:$0xff] }
 0x7ec   : > { %2798 = vadd.xlane.f32.xlu1 %v2797_v5 }
 0x7ed   : > { %6029 = vmatpush3.bf16.msra.mxu1 %v7567_v3 }
 0x7ee   : > { %6030 = vmatprep.subr.bf16.mxu1 %v7921_v12 }
 0x879   : > { %v2799_v5 = vpop.xlane.xlu1 %2798 }
 0x87a   : > { %v2800_v14 = vmul.f32 0.032258064, %v2799_v5  ;;  %v7581_v5 = vld [vmem:[%s7976_s20] ss:$0 sm:$0xff]  ;;  %s7984_s20 = sld [smem:[#allocation43_spill]] }
 0x87c   : > { %6297 = vrsqrt.f32 %v2800_v14  ;;  %vm2803_vm5 = vcmp.eq.f32.partialorder %v2800_v14, inf  ;;  %v2806_v61 = vand.u32 2147483648, %v2800_v14  ;;  %vm2805_vm6 = vcmp.eq.f32.partialorder %v2800_v14, 0.0 }
 0x886   : > { %v6298_v50 = vpop.eup %6297 }
 0x887   : > { %v2802_v18 = vmul.f32 %v6298_v50, %v2800_v14 }
 0x889   : > { %v2804_v33 = vsel %vm2803_vm5, %v2800_v14, %v2802_v18  ;;  %v883_v14 = vld [vmem:[%s7974_s30 + $0x38] sm:$0xff] }
 0x88a   : > { %v2807_v37 = vsel %vm2805_vm6, %v2806_v61, %v2804_v33  ;;  %v7597_v61 = vpack.c.bf16 %v883_v14, %v882_v62 }
 0x88b   : > { %v2815_v28 = vadd.f32 1e-06, %v2807_v37 }
 0x88c   : > { %6032 = vmatpush3.bf16.msra.mxu1 %v7597_v61 }
 0x88d   : > { %6299 = vrcp.f32 %v2815_v28  ;;  %6045 = vmatprep.subr.bf16.mxu1 %v7921_v12 }
 0x897   : > { %v6300_v56 = vpop.eup %6299 }
 0x898   : > { %v2817_v50 = vmul.f32 %v6300_v56, %v2814_v54  ;;  %v7614_v54 = vld [vmem:[%s7978_s25] ss:$0 sm:$0xff] }
 0x899   : > { %7979 = vst [vmem:[#allocation30_spill] sm:$0xff] %v7614_v54 }
 0x89a   : > { %v2824_v18 = vadd.f32 %v7581_v5, %v2817_v50 }
 0x89c   : > { %5700 = vmatmul.mubr.msk.f32.vlgmr.msra.gmra.mrb[26].mxu0 %vm885_vm0, %v2824_v18 }
 0x89d   : > { %6035 = vmatpush3.bf16.msra.mxu0 %v7231_v10  ;;  %5729 = vmatprep.mubr.msk.f32.mxu0 %vm6743_vm1, %v7919_v20  ;;  %v7601_v10 = vld [vmem:[#allocation19] ss:$0 sm:$0xff] }
 0x89e   : > { %6036 = vmatprep.subr.bf16.mxu0 %v7921_v12  ;;  %7977 = vst [vmem:[#allocation29_spill] sm:$0xff] %v7601_v10 }
 0x8a1   : > { %6038 = vmatpush3.bf16.msra.mxu0 %v7241_v17 }
 0x8a2   : > { %6039 = vmatprep.subr.bf16.mxu0 %v7921_v12 }
 0x96f   : > { %v2900_v33 = vpop.f32.mrb[26].mxu0 }
 0x970   : > { %v2901_v17 = vadd.f32 %v7601_v10, %v2900_v33  ;;  %v5701_v37 = vpop.f32.mrb[27].mxu0 }
 0x972   : > { %v2904_v28 = vmax.f32 %v2901_v17, 0.0 }
 0x974   : > { %5719 = vmatmul.mubr.msk.f32.vlgmr.msra.gmra.mrb[22].mxu1 %vm2905_vm7, %v2904_v28 }
 0x975   : > { %6047 = vmatpush3.bf16.msra.mxu1 %v7264_v38  ;;  %5751 = vmatprep.mubr.msk.f32.mxu1 %vm6743_vm1, %v7919_v20 }
 0x976   : > { %6048 = vmatprep.subr.bf16.mxu1 %v7921_v12 }
 0x979   : > { %6050 = vmatpush3.bf16.msra.mxu1 %v7277_v45 }
 0x97a   : > { %6057 = vmatprep.subr.bf16.mxu1 %v7921_v12 }
 0xa47   : > { %v2975_v56 = vpop.f32.mrb[22].mxu1 }
 0xa48   : > { %v2979_v50 = vadd.f32 %v2975_v56, %v7528_v47  ;;  %v5720_v18 = vpop.f32.mrb[23].mxu1 }
 0xa4a   : > { %v7618_v38 = vadd.f32 %v7614_v54, %v2979_v50 }
 0xa4c   : > { %v2987_v62 = vsel %vm885_vm0, %v7618_v38, 0.0 }
 0xa4d   : > { %2988 = vadd.xlane.f32.xlu0 %v2987_v62 }
 0xada   : > { %v2989_v14 = vpop.xlane.xlu0 %2988 }
 0xadb   : > { %v2990_v45 = vmul.f32 0.03125, %v2989_v14 }
 0xadd   : > { %v2991_v33 = vsub.f32 %v7618_v38, %v2990_v45 }
 0xadf   : > { %v2992_v17 = vmul.f32 %v2991_v33, %v2991_v33  ;;  %v3004_v62 = vmul.f32 %v7256_v29, %v2991_v33 }
 0xae1   : > { %v2993_v37 = vsel %vm885_vm0, %v2992_v17, 0.0 }
 0xae2   : > { %2994 = vadd.xlane.f32.xlu1 %v2993_v37 }
 0xb6f   : > { %v2995_v28 = vpop.xlane.xlu1 %2994 }
 0xb70   : > { %v2996_v20 = vmul.f32 0.032258064, %v2995_v28 }
 0xb72   : > { %6301 = vrsqrt.f32 %v2996_v20  ;;  %vm2999_vm8 = vcmp.eq.f32.partialorder %v2996_v20, inf  ;;  %v3002_v50 = vand.u32 2147483648, %v2996_v20  ;;  %vm3001_vm9 = vcmp.eq.f32.partialorder %v2996_v20, 0.0 }
 0xb7c   : > { %v6302_v47 = vpop.eup %6301 }
 0xb7d   : > { %v2998_v56 = vmul.f32 %v6302_v47, %v2996_v20 }
 0xb7f   : > { %v3000_v18 = vsel %vm2999_vm8, %v2996_v20, %v2998_v56  ;;  %v7980_v20 = vmov 0.0|0.0  }
 0xb80   : > { %v3003_v12 = vsel %vm3001_vm9, %v3002_v50, %v3000_v18 }
 0xb81   : > { %v3005_v54 = vadd.f32 1e-06, %v3003_v12  ;;  %v7981_v12 = vmov 0.0  }
 0xb83   : > { %6303 = vrcp.f32 %v3005_v54 }
 0xb8d   : > { %v6304_v14 = vpop.eup %6303 }
 0xb8e   : > { %v3007_v45 = vmul.f32 %v6304_v14, %v3004_v62 }
 0xb90   : > { %v7626_v10 = vadd.f32 %v7262_v36, %v3007_v45 }
 0xb92   : > { %5730 = vmatmul.mubr.msk.f32.vlgmr.msra.gmra.mrb[28].mxu0 %vm885_vm0, %v7626_v10  ;;  %5752 = vmatmul.mubr.msk.f32.vlgmr.msra.gmra.mrb[24].mxu1 %vm885_vm0, %v7626_v10 }
 0xb93   : > { %6041 = vmatpush3.bf16.msra.mxu0 %v7235_v13  ;;  %6059 = vmatpush3.bf16.msra.mxu1 %v7289_v51 }
 0xb94   : > { %6042 = vmatprep.subr.bf16.mxu0 %v7980_v20  ;;  %6060 = vmatprep.subr.bf16.mxu1 %v7980_v20 }
 0xb95   : > { %5740 = vmatprep.mubr.msk.f32.mxu0 %vm6743_vm1, %v7981_v12  ;;  %5773 = vmatprep.mubr.msk.f32.mxu1 %vm6743_vm1, %v7981_v12 }
 0xb97   : > { %6044 = vmatpush3.bf16.msra.mxu0 %v7243_v19  ;;  %6062 = vmatpush3.bf16.msra.mxu1 %v7301_v57 }
 0xb98   : > { %6051 = vmatprep.subr.bf16.mxu0 %v7980_v20  ;;  %6069 = vmatprep.subr.bf16.mxu1 %v7980_v20 }
 0xb9a   : > { %5741 = vmatmul.mubr.msk.f32.vlgmr.msra.gmra.mrb[30].mxu0 %vm885_vm0, %v7626_v10  ;;  %5774 = vmatmul.mubr.msk.f32.vlgmr.msra.gmra.mrb[26].mxu1 %vm885_vm0, %v7626_v10 }
 0xb9b   : > { %6053 = vmatpush3.bf16.msra.mxu0 %v7266_v39  ;;  %6071 = vmatpush3.bf16.msra.mxu1 %v7313_v63 }
 0xb9c   : > { %6054 = vmatprep.subr.bf16.mxu0 %v7980_v20  ;;  %6072 = vmatprep.subr.bf16.mxu1 %v7980_v20 }
 0xb9d   : > { %5762 = vmatprep.mubr.msk.f32.mxu0 %vm6743_vm1, %v7981_v12  ;;  %5795 = vmatprep.mubr.msk.f32.mxu1 %vm6743_vm1, %v7981_v12 }
 0xb9f   : > { %6056 = vmatpush3.bf16.msra.mxu0 %v7279_v46  ;;  %6074 = vmatpush3.bf16.msra.mxu1 %v7325_v6 }
 0xba0   : > { %6063 = vmatprep.subr.bf16.mxu0 %v7980_v20  ;;  %6081 = vmatprep.subr.bf16.mxu1 %v7980_v20 }
 0xba2   : > { %5763 = vmatmul.mubr.msk.f32.vlgmr.msra.gmra.mrb[32].mxu0 %vm885_vm0, %v7626_v10  ;;  %5796 = vmatmul.mubr.msk.f32.vlgmr.msra.gmra.mrb[28].mxu1 %vm885_vm0, %v7626_v10 }
 0xba3   : > { %6065 = vmatpush3.bf16.msra.mxu0 %v7291_v52  ;;  %6083 = vmatpush3.bf16.msra.mxu1 %v7337_v15 }
 0xba4   : > { %6066 = vmatprep.subr.bf16.mxu0 %v7980_v20  ;;  %6084 = vmatprep.subr.bf16.mxu1 %v7980_v20 }
 0xba5   : > { %5784 = vmatprep.mubr.msk.f32.mxu0 %vm6743_vm1, %v7981_v12  ;;  %5817 = vmatprep.mubr.msk.f32.mxu1 %vm6743_vm1, %v7981_v12 }
 0xba7   : > { %6068 = vmatpush3.bf16.msra.mxu0 %v7303_v58  ;;  %6086 = vmatpush3.bf16.msra.mxu1 %v7349_v24 }
 0xba8   : > { %6075 = vmatprep.subr.bf16.mxu0 %v7980_v20  ;;  %6093 = vmatprep.subr.bf16.mxu1 %v7980_v20 }
 0xbaa   : > { %5785 = vmatmul.mubr.msk.f32.vlgmr.msra.gmra.mrb[34].mxu0 %vm885_vm0, %v7626_v10  ;;  %5818 = vmatmul.mubr.msk.f32.vlgmr.msra.gmra.mrb[30].mxu1 %vm885_vm0, %v7626_v10 }
 0xbab   : > { %6077 = vmatpush3.bf16.msra.mxu0 %v7315_v1  ;;  %6095 = vmatpush3.bf16.msra.mxu1 %v7361_v31 }
 0xbac   : > { %6078 = vmatprep.subr.bf16.mxu0 %v7980_v20  ;;  %6096 = vmatprep.subr.bf16.mxu1 %v7980_v20 }
 0xbad   : > { %5806 = vmatprep.mubr.msk.f32.mxu0 %vm6743_vm1, %v7981_v12  ;;  %5839 = vmatprep.mubr.msk.f32.mxu1 %vm6743_vm1, %v7981_v12 }
 0xbaf   : > { %6080 = vmatpush3.bf16.msra.mxu0 %v7327_v7  ;;  %6098 = vmatpush3.bf16.msra.mxu1 %v7373_v40 }
 0xbb0   : > { %6087 = vmatprep.subr.bf16.mxu0 %v7980_v20  ;;  %5853 = vmatprep.subr.mxu1 %v7981_v12 }
 0xbb2   : > { %5807 = vmatmul.mubr.msk.f32.vlgmr.msra.gmra.mrb[36].mxu0 %vm885_vm0, %v7626_v10  ;;  %5840 = vmatmul.mubr.msk.f32.vlgmr.msra.gmra.mrb[32].mxu1 %vm885_vm0, %v7626_v10 }
 0xbb3   : > { %6089 = vmatpush3.bf16.msra.mxu0 %v7339_v16  ;;  %5828 = vmatprep.mubr.msk.f32.mxu0 %vm6743_vm1, %v7981_v12 }
 0xbb4   : > { %6090 = vmatprep.subr.bf16.mxu0 %v7980_v20  ;;  %5855 = vmatprep.mubr.msk.f32.mxu1 %vm6743_vm1, %v7981_v12 }
 0xbb7   : > { %6092 = vmatpush3.bf16.msra.mxu0 %v7351_v25 }
 0xbb8   : > { %6099 = vmatprep.subr.bf16.mxu0 %v7980_v20 }
 0xbba   : > { %5829 = vmatmul.mubr.msk.f32.vlgmr.msra.gmra.mrb[38].mxu0 %vm885_vm0, %v7626_v10 }
 0xbbb   : > { %6101 = vmatpush3.bf16.msra.mxu0 %v7363_v32  ;;  %5850 = vmatprep.mubr.msk.f32.mxu0 %vm6743_vm1, %v7981_v12 }
 0xbbc   : > { %6102 = vmatprep.subr.bf16.mxu0 %v7980_v20 }
 0xbbf   : > { %6104 = vmatpush3.bf16.msra.mxu0 %v7375_v42 }
 0xbc0   : > { %5863 = vmatprep.subr.mxu0 %v7981_v12 }
 0xbc2   : > { %5851 = vmatmul.mubr.msk.f32.vlgmr.msra.gmra.mrb[40].mxu0 %vm885_vm0, %v7626_v10 }
 0xbc3   : > { %5865 = vmatprep.mubr.msk.f32.mxu0 %vm6743_vm1, %v7981_v12 }
 0xc65   : > { %v3078_v13 = vpop.f32.mrb[28].mxu0  ;;  %v3218_v19 = vpop.f32.mrb[24].mxu1 }
 0xc66   : > { %v5731_v29 = vpop.f32.mrb[29].mxu0  ;;  %v5753_v36 = vpop.f32.mrb[25].mxu1  ;;  %v3079_v58 = vadd.f32 %v7397_v41, %v3078_v13  ;;  %v3219_v16 = vadd.f32 %v7418_v21, %v3218_v19 }
 0xc6d   : > { %v3148_v39 = vpop.f32.mrb[30].mxu0  ;;  %v3358_v46 = vpop.f32.mrb[26].mxu1 }
 0xc6e   : > { %v3359_v51 = vadd.f32 %v7395_v55, %v3358_v46  ;;  %v5742_v52 = vpop.f32.mrb[31].mxu0  ;;  %v5775_v57 = vpop.f32.mrb[27].mxu1  ;;  %v3149_v55 = vadd.f32 %v7405_v4, %v3148_v39 }
 0xc70   : > { %5854 = vmatpush3.xpose.msk.msra.mxu1 %vm1843_vm4, %v3359_v51 }
 0xc71   : > { %5858 = vmatprep.subr.mxu1 %v7981_v12 }
 0xc73   : > { %5856 = vmatmul.mubr.msk.f32.vlgmr.msra.gmra.mrb[34].mxu1 %vm1843_vm4, %v3079_v58 }
 0xc74   : > { %5860 = vmatprep.mubr.msk.f32.mxu1 %vm6743_vm1, %v7981_v12 }
 0xc75   : > { %v3288_v63 = vpop.f32.mrb[32].mxu0  ;;  %v3498_v1 = vpop.f32.mrb[28].mxu1 }
 0xc76   : > { %v3499_v6 = vadd.f32 %v7409_v8, %v3498_v1  ;;  %v5764_v7 = vpop.f32.mrb[33].mxu0  ;;  %v5797_v15 = vpop.f32.mrb[29].mxu1  ;;  %v3289_v4 = vadd.f32 %v7420_v22, %v3288_v63 }
 0xc78   : > { %5864 = vmatpush3.xpose.msk.msra.mxu0 %vm1843_vm4, %v3499_v6 }
 0xc79   : > { %5873 = vmatprep.subr.mxu0 %v7981_v12 }
 0xc7b   : > { %5866 = vmatmul.mubr.msk.f32.vlgmr.msra.gmra.mrb[42].mxu0 %vm1843_vm4, %v3219_v16 }
 0xc7c   : > { %5875 = vmatprep.mubr.msk.f32.mxu0 %vm6743_vm1, %v7981_v12 }
 0xc7d   : > { %v3428_v24 = vpop.f32.mrb[34].mxu0  ;;  %v3638_v25 = vpop.f32.mrb[30].mxu1 }
 0xc7e   : > { %v3429_v31 = vadd.f32 %v7400_v2, %v3428_v24  ;;  %v3639_v32 = vadd.f32 %v7435_v34, %v3638_v25  ;;  %v5786_v40 = vpop.f32.mrb[35].mxu0  ;;  %v5819_v42 = vpop.f32.mrb[31].mxu1 }
 0xc80   : > { %5859 = vmatpush3.xpose.msk.msra.mxu1 %vm1843_vm4, %v3429_v31  ;;  %5874 = vmatpush3.msra.mxu0 %v3639_v32 }
 0xc81   : > { %5868 = vmatprep.subr.mxu1 %v7981_v12  ;;  %5883 = vmatprep.subr.mxu0 %v7981_v12 }
 0xc83   : > { %5861 = vmatmul.mubr.msk.f32.vlgmr.msra.gmra.mrb[36].mxu1 %vm1843_vm4, %v3149_v55 }
 0xc84   : > { %5870 = vmatprep.mubr.msk.f32.mxu1 %vm6743_vm1, %v7981_v12 }
 0xc85   : > { %v3568_v41 = vpop.f32.mrb[36].mxu0  ;;  %v7739_v2 = vpop.f32.mrb[32].mxu1 }
 0xc86   : > { %v3569_v8 = vadd.f32 %v7411_v9, %v3568_v41  ;;  %v5808_v21 = vpop.f32.mrb[37].mxu0  ;;  %v5841_v34 = vpop.f32.mrb[33].mxu1 }
 0xc88   : > { %5869 = vmatpush3.xpose.msk.msra.mxu1 %vm1843_vm4, %v3569_v8 }
 0xc89   : > { %5878 = vmatprep.subr.mxu1 %v7981_v12 }
 0xc8b   : > { %5871 = vmatmul.mubr.msk.f32.vlgmr.msra.gmra.mrb[38].mxu1 %vm1843_vm4, %v3289_v4 }
 0xc8c   : > { %5880 = vmatprep.mubr.msk.f32.mxu1 %vm6743_vm1, %v7981_v12 }
 0xc8d   : > { %v3708_v10 = vpop.f32.mrb[38].mxu0 }
 0xc8e   : > { %v3709_v54 = vadd.f32 %v7437_v35, %v3708_v10  ;;  %v5830_v33 = vpop.f32.mrb[39].mxu0  ;;  %v3779_v10 = vadd.f32 %v7470_v48, %v7739_v2 }
 0xc90   : > { %5879 = vmatpush3.msra.mxu1 %v3709_v54 }
 0xc91   : > { %5888 = vmatprep.subr.mxu1 %v7981_v12 }
 0xc95   : > { %v7750_v9 = vpop.f32.mrb[40].mxu0 }
 0xc96   : > { %v5852_v17 = vpop.f32.mrb[41].mxu0 }
 0xd46   : > { %v3924_v37 = vpop.f32.mrb[34].mxu1 }
 0xd47   : > { %v3925_v22 = vadd.f32 %v7456_v59, %v3924_v37  ;;  %v5857_v28 = vpop.f32.mrb[35].mxu1 }
 0xd49   : > { %v4156_v47 = vsel %vm1843_vm4, %v3925_v22, -inf }
 0xd4a   : > { %4157 = vmax.xlane.f32.xlu0 %v4156_v47 }
 0xd4e   : > { %v4076_v56 = vpop.f32.mrb[42].mxu0 }
 0xd4f   : > { %v4077_v50 = vadd.f32 %v7456_v59, %v4076_v56  ;;  %v5867_v18 = vpop.f32.mrb[43].mxu0 }
 0xd51   : > { %v4162_v35 = vsel %vm1843_vm4, %v4077_v50, -inf }
 0xd52   : > { %4163 = vmax.xlane.f32.xlu0 %v4162_v35 }
 0xd56   : > { %v4000_v62 = vpop.f32.mrb[36].mxu1 }
 0xd57   : > { %v4001_v14 = vadd.f32 %v7456_v59, %v4000_v62  ;;  %v5862_v45 = vpop.f32.mrb[37].mxu1 }
 0xd59   : > { %v4159_v13 = vsel %vm1843_vm4, %v4001_v14, -inf }
 0xd5a   : > { %4160 = vmax.xlane.f32.xlu1 %v4159_v13 }
 0xd5e   : > { %v4152_v19 = vpop.f32.mrb[38].mxu1 }
 0xd5f   : > { %v4153_v29 = vadd.f32 %v7456_v59, %v4152_v19  ;;  %v5872_v36 = vpop.f32.mrb[39].mxu1 }
 0xd61   : > { %v4165_v39 = vsel %vm1843_vm4, %v4153_v29, -inf }
 0xd62   : > { %4166 = vmax.xlane.f32.xlu1 %v4165_v39 }
 0xdd7   : > { %v4158_v46 = vpop.xlane.xlu0 %4157 }
 0xdd8   : > { %v4168_v51 = vsub.f32 %v3925_v22, %v4158_v46  ;;  %v3849_v22 = vadd.f32 %v7474_v60, %v7750_v9 }
 0xdda   : > { %v4172_v52 = vmul.f32 1.442695, %v4168_v51 }
 0xddc   : > { %6305 = vpow2.f32 %v4172_v52 }
 0xddf   : > { %v4164_v57 = vpop.xlane.xlu0 %4163 }
 0xde0   : > { %v4170_v58 = vsub.f32 %v4077_v50, %v4164_v57 }
 0xde2   : > { %v4176_v63 = vmul.f32 1.442695, %v4170_v58 }
 0xde4   : > { %6307 = vpow2.f32 %v4176_v63 }
 0xde6   : > { %v6306_v1 = vpop.eup %6305 }
 0xde7   : > { %v4161_v6 = vpop.xlane.xlu1 %4160  ;;  %v4180_v7 = vsel %vm1843_vm4, %v6306_v1, 0.0 }
 0xde8   : > { %v4169_v15 = vsub.f32 %v4001_v14, %v4161_v6  ;;  %4181 = vadd.xlane.f32.xlu0 %v4180_v7 }
 0xdea   : > { %v4174_v16 = vmul.f32 1.442695, %v4169_v15 }
 0xdec   : > { %6309 = vpow2.f32 %v4174_v16 }
 0xdee   : > { %v6308_v59 = vpop.eup %6307 }
 0xdef   : > { %v4167_v24 = vpop.xlane.xlu1 %4166  ;;  %v4186_v25 = vsel %vm1843_vm4, %v6308_v59, 0.0 }
 0xdf0   : > { %v4171_v31 = vsub.f32 %v4153_v29, %v4167_v24  ;;  %4187 = vadd.xlane.f32.xlu0 %v4186_v25 }
 0xdf2   : > { %v4178_v32 = vmul.f32 1.442695, %v4171_v31 }
 0xdf4   : > { %6311 = vpow2.f32 %v4178_v32 }
 0xdf6   : > { %v6310_v40 = vpop.eup %6309 }
 0xdf7   : > { %v4183_v42 = vsel %vm1843_vm4, %v6310_v40, 0.0 }
 0xdf8   : > { %4184 = vadd.xlane.f32.xlu1 %v4183_v42 }
 0xdfe   : > { %v6312_v55 = vpop.eup %6311 }
 0xdff   : > { %v4189_v41 = vsel %vm1843_vm4, %v6312_v55, 0.0 }
 0xe00   : > { %4190 = vadd.xlane.f32.xlu1 %v4189_v41 }
 0xe75   : > { %v4182_v8 = vpop.xlane.xlu0 %4181 }
 0xe76   : > { %6313 = vrcp.f32 %v4182_v8 }
 0xe7d   : > { %v4188_v21 = vpop.xlane.xlu0 %4187 }
 0xe7e   : > { %6315 = vrcp.f32 %v4188_v21 }
 0xe80   : > { %v6314_v34 = vpop.eup %6313 }
 0xe81   : > { %v4196_v4 = vmul.f32 %v6314_v34, %v6306_v1 }
 0xe83   : > { %5876 = vmatmul.mubr.msk.f32.vlgmr.msra.gmra.mrb[44].mxu0 %vm1843_vm4, %v4196_v4  ;;  %v7983_v4 = vld [vmem:[#allocation30_spill] sm:$0xff] }
 0xe84   : > { %5884 = vmatpush3.msra.mxu0 %v3779_v10  ;;  %5885 = vmatprep.mubr.msk.f32.mxu0 %vm6743_vm1, %v7981_v12 }
 0xe85   : > { %v4185_v54 = vpop.xlane.xlu1 %4184  ;;  %5893 = vmatprep.subr.mxu0 %v7981_v12 }
 0xe86   : > { %6317 = vrcp.f32 %v4185_v54 }
 0xe88   : > { %v6316_v33 = vpop.eup %6315 }
 0xe89   : > { %v4198_v17 = vmul.f32 %v6316_v33, %v6308_v59 }
 0xe8b   : > { %5886 = vmatmul.mubr.msk.f32.vlgmr.msra.gmra.mrb[46].mxu0 %vm1843_vm4, %v4198_v17 }
 0xe8c   : > { %5894 = vmatpush3.msra.mxu0 %v7492_v53  ;;  %5895 = vmatprep.mubr.msk.f32.mxu0 %vm6743_vm1, %v7981_v12 }
 0xe8d   : > { %v4191_v48 = vpop.xlane.xlu1 %4190  ;;  %5903 = vmatprep.subr.mxu0 %v7981_v12 }
 0xe8e   : > { %6319 = vrcp.f32 %v4191_v48 }
 0xe90   : > { %v6318_v2 = vpop.eup %6317 }
 0xe91   : > { %v4197_v37 = vmul.f32 %v6318_v2, %v6310_v40  ;;  %v7982_v40 = vld [vmem:[#allocation29_spill] sm:$0xff] }
 0xe93   : > { %5881 = vmatmul.mubr.msk.f32.vlgmr.msra.gmra.mrb[40].mxu1 %vm1843_vm4, %v4197_v37 }
 0xe94   : > { %5889 = vmatpush3.msra.mxu1 %v3849_v22  ;;  %5890 = vmatprep.mubr.msk.f32.mxu1 %vm6743_vm1, %v7981_v12 }
 0xe95   : > { %5898 = vmatprep.subr.mxu1 %v7981_v12 }
 0xe98   : > { %v6320_v53 = vpop.eup %6319 }
 0xe99   : > { %v4199_v28 = vmul.f32 %v6320_v53, %v6312_v55 }
 0xe9b   : > { %5891 = vmatmul.mubr.msk.f32.vlgmr.msra.gmra.mrb[42].mxu1 %vm1843_vm4, %v4199_v28 }
 0xe9c   : > { %5899 = vmatpush3.msra.mxu1 %v7496_v26  ;;  %5900 = vmatprep.mubr.msk.f32.mxu1 %vm6743_vm1, %v7981_v12 }
 0xe9d   : > { %5908 = vmatprep.subr.mxu1 %v7981_v12 }
 0xf56   : > { %v4269_v60 = vpop.f32.mrb[44].mxu0 }
 0xf57   : > { %v5877_v9 = vpop.f32.mrb[45].mxu0  ;;  %5896 = vmatmul.mubr.msk.f32.vlgmr.msra.gmra.mrb[48].mxu0 %vm1843_vm4, %v4269_v60 }
 0xf58   : > { %5904 = vmatpush3.msra.mxu0 %v7500_v30  ;;  %5905 = vmatprep.mubr.msk.f32.mxu0 %vm6743_vm1, %v7981_v12 }
 0xf59   : > { %6105 = vmatprep.subr.bf16.mxu0 %v7980_v20 }
 0xf5e   : > { %v4415_v47 = vpop.f32.mrb[46].mxu0 }
 0xf5f   : > { %v5887_v56 = vpop.f32.mrb[47].mxu0  ;;  %5906 = vmatmul.mubr.msk.f32.vlgmr.msra.gmra.mrb[50].mxu0 %vm1843_vm4, %v4415_v47 }
 0xf60   : > { %6107 = vmatpush3.bf16.msra.mxu0 %v7534_v23  ;;  %5921 = vmatprep.mubr.msk.f32.mxu0 %vm6743_vm1, %v7981_v12  ;;  %v5297_v56 = vld [vmem:[%s7984_s20] ss:$0 sm:$0xff]  ;;  %s6645_s20 = scalar_lea.vmem %s6644_s0, 256 }
 0xf61   : > { %6108 = vmatprep.subr.bf16.mxu0 %v7980_v20  ;;  %p6647_p4 = scmp.lt.s32.totalorder %s6645_s20, %s6639_s17 }
 0xf63   : > { %p6648_p8 = por %p6647_p4, %p6646_p9 }
 0xf64   : > { %6110 = vmatpush3.bf16.msra.mxu0 %v7537_v0 }
 0xf65   : > { %p6649_p0 = pnand %p6648_p8, %p6642_p7 }
 0xf66   : > { %v4342_v26 = vpop.f32.mrb[40].mxu1 }
 0xf67   : > { %v5882_v30 = vpop.f32.mrb[41].mxu1  ;;  %5901 = vmatmul.mubr.msk.f32.vlgmr.msra.gmra.mrb[44].mxu1 %vm1843_vm4, %v4342_v26 }
 0xf68   : > { %5909 = vmatpush3.msra.mxu1 %v7506_v11  ;;  %5910 = vmatprep.mubr.msk.f32.mxu1 %vm6743_vm1, %v7981_v12 }
 0xf69   : > { %6111 = vmatprep.subr.bf16.mxu1 %v7980_v20 }
 0xf6e   : > { %v4488_v50 = vpop.f32.mrb[42].mxu1 }
 0xf6f   : > { %v5892_v23 = vpop.f32.mrb[43].mxu1  ;;  %5911 = vmatmul.mubr.msk.f32.vlgmr.msra.gmra.mrb[46].mxu1 %vm1843_vm4, %v4488_v50  ;;  %v5298_v50 = vld [vmem:[%s7985_s26] ss:$0 sm:$0xff] }
 0xf70   : > { %6113 = vmatpush3.bf16.msra.mxu1 %v7551_v43  ;;  %5940 = vmatprep.mubr.msk.f32.mxu1 %vm6743_vm1, %v7981_v12 }
 0xf71   : > { %6114 = vmatprep.subr.bf16.mxu1 %v7980_v20 }
 0xf74   : > { %6116 = vmatpush3.bf16.msra.mxu1 %v7557_v49 }
 0xf75   : > { %6117 = vmatprep.subr.bf16.mxu1 %v7980_v20 }
 0xf78   : > { %6119 = vmatpush3.bf16.msra.mxu1 %v7567_v3 }
 0xf79   : > { %6120 = vmatprep.subr.bf16.mxu1 %v7980_v20 }
 0xf7c   : > { %6122 = vmatpush3.bf16.msra.mxu1 %v7597_v61 }
0x102a   : > { %v4561_v11 = vpop.f32.mrb[48].mxu0 }
0x102b   : > { %v5897_v0 = vpop.f32.mrb[49].mxu0  ;;  %v4784_v62 = vsel %vm885_vm0, %v4561_v11, 0.0 }
0x1032   : > { %v4707_v18 = vpop.f32.mrb[50].mxu0 }
0x1033   : > { %v5907_v35 = vpop.f32.mrb[51].mxu0  ;;  %v4787_v49 = vsel %vm885_vm0, %v4707_v18, 0.0 }
0x103a   : > { %v4634_v43 = vpop.f32.mrb[44].mxu1 }
0x103b   : > { %v4785_v12 = vsel %vm885_vm0, %v4634_v43, 0.0  ;;  %v5902_v14 = vpop.f32.mrb[45].mxu1 }
0x103c   : > { %v4786_v45 = vadd.f32 %v4785_v12, %v4784_v62 }
0x103e   : > { %v4788_v13 = vadd.f32 %v4787_v49, %v4786_v45 }
0x1042   : > { %v4780_v19 = vpop.f32.mrb[46].mxu1 }
0x1043   : > { %v4789_v3 = vsel %vm885_vm0, %v4780_v19, 0.0  ;;  %v5912_v20 = vpop.f32.mrb[47].mxu1 }
0x1044   : > { %v4790_v29 = vadd.f32 %v4789_v3, %v4788_v13 }
0x1046   : > { %v4791_v61 = vadd.f32 %v7523_v27, %v4790_v29 }
0x1048   : > { %v4792_v36 = vadd.f32 %v4791_v61, %v7618_v38 }
0x104a   : > { %v4793_v39 = vsel %vm885_vm0, %v4792_v36, 0.0 }
0x104b   : > { %4794 = vadd.xlane.f32.xlu0 %v4793_v39 }
0x10d8   : > { %v4795_v46 = vpop.xlane.xlu0 %4794 }
0x10d9   : > { %v4796_v51 = vmul.f32 0.03125, %v4795_v46 }
0x10db   : > { %v4797_v52 = vsub.f32 %v4792_v36, %v4796_v51 }
0x10dd   : > { %v4798_v57 = vmul.f32 %v4797_v52, %v4797_v52  ;;  %v4810_v59 = vmul.f32 %v7575_v44, %v4797_v52 }
0x10df   : > { %v4799_v58 = vsel %vm885_vm0, %v4798_v57, 0.0 }
0x10e0   : > { %4800 = vadd.xlane.f32.xlu1 %v4799_v58 }
0x116d   : > { %v4801_v63 = vpop.xlane.xlu1 %4800 }
0x116e   : > { %v4802_v1 = vmul.f32 0.032258064, %v4801_v63 }
0x1170   : > { %6321 = vrsqrt.f32 %v4802_v1  ;;  %vm4805_vm10 = vcmp.eq.f32.partialorder %v4802_v1, inf  ;;  %v4808_v15 = vand.u32 2147483648, %v4802_v1  ;;  %vm4807_vm11 = vcmp.eq.f32.partialorder %v4802_v1, 0.0 }
0x117a   : > { %v6322_v6 = vpop.eup %6321 }
0x117b   : > { %v4804_v7 = vmul.f32 %v6322_v6, %v4802_v1 }
0x117d   : > { %v4806_v27 = vsel %vm4805_vm10, %v4802_v1, %v4804_v7 }
0x117e   : > { %v4809_v38 = vsel %vm4807_vm11, %v4808_v15, %v4806_v27 }
0x117f   : > { %v4811_v16 = vadd.f32 1e-06, %v4809_v38 }
0x1181   : > { %6323 = vrcp.f32 %v4811_v16 }
0x118b   : > { %v6324_v24 = vpop.eup %6323 }
0x118c   : > { %v4813_v25 = vmul.f32 %v6324_v24, %v4810_v59 }
0x118e   : > { %v4814_v31 = vadd.f32 %v7581_v5, %v4813_v25 }
0x1190   : > { %5922 = vmatmul.mubr.msk.f32.vlgmr.msra.gmra.mrb[52].mxu0 %vm885_vm0, %v4814_v31 }
0x1263   : > { %v4884_v32 = vpop.f32.mrb[52].mxu0 }
0x1264   : > { %v4885_v42 = vadd.f32 %v7982_v40, %v4884_v32  ;;  %v5923_v55 = vpop.f32.mrb[53].mxu0 }
0x1266   : > { %v4888_v41 = vmax.f32 %v4885_v42, 0.0 }
0x1268   : > { %5941 = vmatmul.mubr.msk.f32.vlgmr.msra.gmra.mrb[48].mxu1 %vm2905_vm7, %v4888_v41 }
0x133b   : > { %v4958_v8 = vpop.f32.mrb[48].mxu1 }
0x133c   : > { %v4962_v21 = vadd.f32 %v4958_v8, %v4792_v36  ;;  %v5942_v34 = vpop.f32.mrb[49].mxu1 }
0x133e   : > { %v4963_v10 = vadd.f32 %v7983_v4, %v4962_v21 }
0x1340   : > { %v4966_v44 = vsel %vm885_vm0, %v4963_v10, 0.0 }
0x1341   : > { %4967 = vadd.xlane.f32.xlu0 %v4966_v44 }
0x13ce   : > { %v4968_v54 = vpop.xlane.xlu0 %4967 }
0x13cf   : > { %v4969_v33 = vmul.f32 0.03125, %v4968_v54 }
0x13d1   : > { %v4970_v5 = vsub.f32 %v4963_v10, %v4969_v33 }
0x13d3   : > { %v4971_v17 = vmul.f32 %v4970_v5, %v4970_v5  ;;  %v4989_v26 = vmul.f32 %v5297_v56, %v4970_v5 }
0x13d5   : > { %v4972_v48 = vsel %vm885_vm0, %v4971_v17, 0.0 }
0x13d6   : > { %4973 = vadd.xlane.f32.xlu1 %v4972_v48 }
0x1463   : > { %v4974_v2 = vpop.xlane.xlu1 %4973 }
0x1464   : > { %v4975_v37 = vmul.f32 0.032258064, %v4974_v2 }
0x1466   : > { %6325 = vrsqrt.f32 %v4975_v37  ;;  %vm4978_vm12 = vcmp.eq.f32.partialorder %v4975_v37, inf  ;;  %v4981_v28 = vand.u32 2147483648, %v4975_v37  ;;  %vm4980_vm13 = vcmp.eq.f32.partialorder %v4975_v37, 0.0 }
0x1470   : > { %v6326_v22 = vpop.eup %6325 }
0x1471   : > { %v4977_v53 = vmul.f32 %v6326_v22, %v4975_v37 }
0x1473   : > { %v4979_v60 = vsel %vm4978_vm12, %v4975_v37, %v4977_v53 }
0x1474   : > { %v4982_v9 = vsel %vm4980_vm13, %v4981_v28, %v4979_v60 }
0x1475   : > { %v4990_v47 = vadd.f32 1e-06, %v4982_v9 }
0x1477   : > { %6327 = vrcp.f32 %v4990_v47 }
0x1481   : > { %v6328_v30 = vpop.eup %6327 }
0x1482   : > { %v4992_v23 = vmul.f32 %v6328_v30, %v4989_v26 }
0x1484   : > { %v4999_v11 = vadd.f32 %v5298_v50, %v4992_v23 }
0x1486   : > { %5000 = vst.msk [vmem:[%s796_s27] sm:$0xff] %vm885_vm0, %v4999_v11 }
0x1487   : > { %6652 = shalt.err (!%p6649_p0)
}
0x1488   : > { %s6653_s7 = scalar_lea.hbm %s7840_s9, 128  ;;  %s6657_s18 = scalar_lea.hbm %s7986_s8, 256 }
0x1489   : > { %p6654_p2 = scmp.ne.s32.totalorder %s7840_s9, %s6653_s7  ;;  %p6658_p10 = scmp.lt.u32.totalorder %s7840_s9, %s7986_s8 }
0x148a   : > { %p6659_p1 = scmp.lt.u32.totalorder %s6657_s18, %s6653_s7  ;;  %p6661_p12 = scmp.lt.u32.totalorder %s6653_s7, %s7840_s9 }
0x148b   : > { %p6655_p6 = pnand %p6654_p2, %p7987_p13 }
0x148c   : > { %p6660_p11 = por %p6659_p1, %p6658_p10 }
0x148d   : > { %p6656_p5 = pneg %p6655_p6 }
0x148e   : > { %p6662_p3 = por %p6661_p12, %p6660_p11 }
0x1490   : > { %p6663_p7 = pnand %p6662_p3, %p6656_p5 }
0x1492   : > { %6666 = shalt.err (!%p6663_p7)
}
0x1493   : > { %6165 = dma.vmem_to_hbm [thread:$0]  (%p7987_p13), %s7842_s5, 128, %s7840_s9, %s5002_s6  }
0x1494 PF: > { %s5027_s27 = sand.u32 1, %s6713_s1   ;;  %p7988_p9 = scmp.ne.s32.totalorder %s7956_s2, 0 }
0x1495   : > { %p7989_p4 = scmp.ge.s32.totalorder %s6725_s24, 2  ;;  %s5028_s25 = scalar_lea.sflag [#allocation4], %s5027_s27 }
0x1497   : > { %p6203_p8 = pnand %p7989_p4, %p7988_p9 }
0x1499   : > { %6708 = dma.done.wait (!%p6203_p8), %s5028_s25, 128  }
0x149a   : > { %6710 = vsyncadd (!%p6203_p8), %s5028_s25, 4294967168  ;;  %p38_p0 = scmp.ge.s32.totalorder %s7119_s4, 4   ;;  %s7990_s1 = smov %s6717_s22 }
0x149b   : > { %s7991_s22 = smov %s6721_s23  ;;  %s7992_s23 = smov %s7130_s28 }
0x149c   : > { %s7993_s24 = smov %s7119_s4  ;;  %40 = sbr.rel (!%p38_p0) target bundleno = 26 (0x1a), region = 188 }
0x14a3   :  { %5033 = vsyncpa [#allocation3], 1 }
0x14a4   :  { %5035 = vsyncpa [#allocation3 + $0x1], 1 }
0x14a5   :  { %5036 = vsyncpa [#allocation6], 1 }
0x14a6   :  { %5037 = vsyncpa [#allocation9], 1 }
0x14a7   :  { %5038 = vsyncpa [#allocation12], 1 }
0x14a8   :  { %5039 = vsyncpa [#allocation15], 1 }
0x14a9   :  { %5040 = vsyncpa [#allocation18], 1 }
0x14aa   :  { %5041 = vsyncpa [#allocation4], 1 }
0x14ab   :  { %5043 = vsyncpa [#allocation4 + $0x1], 1 }

</bundles_post_ra>
